<compile_context>
chip_gen: v5e
topology: v5e:2x2
jax: 0.10.0
libtpu: 0.0.40
codegen_flags: <defaults>
</compile_context>

<pallas_src>
import jax
import jax.numpy as jnp
from jax.experimental import pallas as pl
from jax.experimental.pallas import tpu as pltpu


def _rel_pos_kernel(q_ref, kw_ref, kh_ref, ow_ref, oh_ref):
    # q_ref : (TH, W, D)   query rows for this (batch*head, H-tile) grid step
    # kw_ref: (W,  S, D)   key_rel_w rows pre-gathered per width position (resident)
    # kh_ref: (TH, S, D)   key_rel_h rows pre-gathered per height position (this tile)
    # ow_ref, oh_ref: (TH, W, S, S)
    q = q_ref[...].astype(jnp.float32)
    kw = kw_ref[...].astype(jnp.float32)
    kh = kh_ref[...].astype(jnp.float32)

    th, w, _ = q.shape
    s = kw.shape[1]

    # h-branch: gh[x, y, s] = sum_d q[x, y, d] * kh[x, s, d]  (batched over x -> MXU)
    gh = jnp.einsum('xyd,xsd->xys', q, kh, preferred_element_type=jnp.float32)

    # w-branch: gw[x, y, s] = sum_d q[x, y, d] * kw[y, s, d]
    # The batch axis (y) is not leading for q; a batched dot would emit (W, TH, S) and
    # require an in-kernel transpose, so do it on the VPU (negligible vs output store).
    gw = jnp.sum(q[:, :, None, :] * kw[None, :, :, :], axis=-1)          # (TH, W, S)

    # Broadcast into the (shape, shape) tiles exactly as the PyTorch repeat/rearrange:
    #   out_w[x, y, hh, ww] = gw[x, y, ww]   (broadcast over hh)
    #   out_h[x, y, hh, ww] = gh[x, y, hh]   (broadcast over ww)
    ow_ref[...] = jnp.broadcast_to(gw[:, :, None, :], (th, w, s, s)).astype(ow_ref.dtype)
    oh_ref[...] = jnp.broadcast_to(gh[:, :, :, None], (th, w, s, s)).astype(oh_ref.dtype)


def _pick_tile_h(H, W, S, D):
    """Largest divisor of H whose per-step working set stays within ~4 MiB."""
    budget = 4 * 1024 * 1024
    per_row = 4 * (2 * (W * D + S * D + 2 * W * S * S)   # double-buffered in/out blocks
                   + W * S * D + 2 * W * S)              # in-kernel fp32 temporaries
    th = 1
    for cand in range(1, H + 1):
        if H % cand == 0 and cand * per_row <= budget:
            th = cand
    return th


def relative_position_embedding(q, key_rel_w, key_rel_h, Nh, H, W, dim_head, shape):
    """Forward of RelativePositionEmbedding.

    Args:
      q          : (B, Nh, H*W, dim_head)
      key_rel_w  : (2*shape - 1, dim_head)
      key_rel_h  : (2*shape - 1, dim_head)
    Returns:
      (rel_logits_w, rel_logits_h), each (B, Nh, H*W, shape*shape).
    """
    B = q.shape[0]
    S = shape
    D = dim_head
    assert q.shape == (B, Nh, H * W, D), q.shape
    assert key_rel_w.shape == (2 * S - 1, D)
    assert key_rel_h.shape == (2 * S - 1, D)
    assert W % S == 0 and H % S == 0, "spatial extent must be a multiple of `shape`"

    # relative_position_index, exactly as in __init__.
    coords = jnp.arange(S)
    rpi = (coords[None, :] - coords[:, None]) + (S - 1)               # (S, S) in [0, 2S-2]
    # (The torch code hits an undefined-variable bug when W == shape; the intended
    #  behaviour — use the base index — is implemented here.)
    idx_w = rpi if W == S else jnp.repeat(rpi, W // S, axis=0)        # (W, S)
    idx_h = rpi if H == S else jnp.repeat(rpi, H // S, axis=0)        # (H, S)

    # Fold the data-independent torch.gather into a gather of the keys (tiny, wrapper-side).
    kw_sel = key_rel_w[idx_w]                                         # (W, S, D)
    kh_sel = key_rel_h[idx_h]                                         # (H, S, D)

    BN = B * Nh
    q_rows = q.reshape(BN * H, W, D)                                  # pure reshape

    TH = _pick_tile_h(H, W, S, D)
    n_h = H // TH

    itemsize = jnp.dtype(q.dtype).itemsize
    cost = pl.CostEstimate(
        flops=int(4 * BN * H * W * S * D),
        transcendentals=0,
        bytes_accessed=int(itemsize * (q_rows.size + kw_sel.size + kh_sel.size
                                       + 2 * BN * H * W * S * S)),
    )

    out_struct = jax.ShapeDtypeStruct((BN * H, W, S, S), q.dtype)
    ow, oh = pl.pallas_call(
        _rel_pos_kernel,
        out_shape=(out_struct, out_struct),
        grid=(BN, n_h),
        in_specs=[
            pl.BlockSpec((TH, W, D), lambda bn, h: (bn * n_h + h, 0, 0)),
            pl.BlockSpec((W, S, D), lambda bn, h: (0, 0, 0)),         # stays resident in VMEM
            pl.BlockSpec((TH, S, D), lambda bn, h: (h, 0, 0)),
        ],
        out_specs=(
            pl.BlockSpec((TH, W, S, S), lambda bn, h: (bn * n_h + h, 0, 0, 0)),
            pl.BlockSpec((TH, W, S, S), lambda bn, h: (bn * n_h + h, 0, 0, 0)),
        ),
        compiler_params=pltpu.CompilerParams(
            dimension_semantics=("parallel", "parallel"),
            vmem_limit_bytes=32 * 1024 * 1024,
        ),
        cost_estimate=cost,
    )(q_rows, kw_sel, kh_sel)

    # Row-major order of (BN*H, W, S, S) is already (b, nh, x*W+y, hh*S+ww).
    rel_logits_w = ow.reshape(B, Nh, H * W, S * S)
    rel_logits_h = oh.reshape(B, Nh, H * W, S * S)
    return rel_logits_w, rel_logits_h


# ----------------------- pure-JAX reference (faithful to the PyTorch code) -----------------------

def _ref_relative_logits_1d(q_loc, rel_k, rpi, S, case):
    B, Nh, X, Y, _ = q_loc.shape
    logits = jnp.einsum('bhxyd,md->bhxym', q_loc, rel_k)              # (B,Nh,X,Y,2S-1)
    idx = rpi if Y == S else jnp.repeat(rpi, Y // S, axis=0)          # (Y, S)
    idx_b = jnp.broadcast_to(idx[None, None, None, :, :], (B, Nh, X, Y, S))
    gathered = jnp.take_along_axis(logits, idx_b, axis=4)             # (B,Nh,X,Y,S)
    rep = jnp.broadcast_to(gathered[:, :, :, None, :, :], (B, Nh, X, S, Y, S))
    if case == 'w':   # 'b heads H h W w -> b heads (H W) (h w)'
        return rep.transpose(0, 1, 2, 4, 3, 5).reshape(B, Nh, X * Y, S * S)
    else:             # 'b heads W w H h -> b heads (H W) (h w)'
        return rep.transpose(0, 1, 4, 2, 5, 3).reshape(B, Nh, X * Y, S * S)


def _ref_forward(q, key_rel_w, key_rel_h, Nh, H, W, dim_head, shape):
    B = q.shape[0]
    S = shape
    coords = jnp.arange(S)
    rpi = (coords[None, :] - coords[:, None]) + (S - 1)
    q5 = q.reshape(B, Nh, H, W, dim_head)
    out_w = _ref_relative_logits_1d(q5, key_rel_w, rpi, S, 'w')
    out_h = _ref_relative_logits_1d(q5.transpose(0, 1, 3, 2, 4), key_rel_h, rpi, S, 'h')
    return out_w, out_h


if __name__ == "__main__":
    def _run_case(B, Nh, H, W, dim_head, shape):
        S = shape
        key = jax.random.PRNGKey(0)
        kq, k1, k2 = jax.random.split(key, 3)
        q = jax.random.normal(kq, (B, Nh, H * W, dim_head), dtype=jnp.float32)
        key_rel_w = jax.random.normal(k1, (2 * S - 1, dim_head), dtype=jnp.float32) * 0.02
        key_rel_h = jax.random.normal(k2, (2 * S - 1, dim_head), dtype=jnp.float32) * 0.02

        out_w, out_h = relative_position_embedding(q, key_rel_w, key_rel_h,
                                                   Nh, H, W, dim_head, S)
        out_w, out_h = jax.block_until_ready((out_w, out_h))

        ref_w, ref_h = _ref_forward(q, key_rel_w, key_rel_h, Nh, H, W, dim_head, S)
        assert out_w.shape == (B, Nh, H * W, S * S), out_w.shape
        assert out_h.shape == (B, Nh, H * W, S * S), out_h.shape
        assert jnp.allclose(out_w, ref_w, atol=1e-5, rtol=1e-5), "rel_logits_w mismatch"
        assert jnp.allclose(out_h, ref_h, atol=1e-5, rtol=1e-5), "rel_logits_h mismatch"

    # H == W == shape (usual case) and H == W == 2*shape (exercises the
    # repeat_interleave'd relative index path).
    _run_case(B=2, Nh=2, H=8, W=8, dim_head=32, shape=8)
    _run_case(B=2, Nh=2, H=16, W=16, dim_head=32, shape=8)
    print("KERNEL_OK")
</pallas_src>

<mosaic_0001>
module attributes {stable_mosaic.version = 11 : i64} {
  func.func @_rel_pos_kernel(%arg0: i32, %arg1: i32, %arg2: memref<8x8x32xf32, #tpu.memory_space<vmem>>, %arg3: memref<8x8x32xf32, #tpu.memory_space<vmem>>, %arg4: memref<8x8x32xf32, #tpu.memory_space<vmem>>, %arg5: memref<8x8x8x8xf32, #tpu.memory_space<vmem>>, %arg6: memref<8x8x8x8xf32, #tpu.memory_space<vmem>>) attributes {dimension_semantics = [#tpu.dimension_semantics<parallel>, #tpu.dimension_semantics<parallel>], iteration_bounds = array<i64: 4, 1>, scalar_prefetch = 0 : i64, scratch_operands = 0 : i64, tpu.core_type = #tpu.core_type<tc>, window_params = [{transform_indices = @transform_0, window_bounds = array<i64: 8, 8, 32>}, {pipeline_mode = #tpu.pipeline_mode<synchronous>, transform_indices = @transform_1, window_bounds = array<i64: 8, 8, 32>}, {transform_indices = @transform_2, window_bounds = array<i64: 8, 8, 32>}, {transform_indices = @transform_3, window_bounds = array<i64: 8, 8, 8, 8>}, {transform_indices = @transform_4, window_bounds = array<i64: 8, 8, 8, 8>}]} {
    %c0 = arith.constant 0 : index
    %c0_0 = arith.constant 0 : index
    %c0_1 = arith.constant 0 : index
    %0 = vector.load %arg2[%c0, %c0_0, %c0_1] : memref<8x8x32xf32, #tpu.memory_space<vmem>>, vector<8x8x32xf32>
    %c0_2 = arith.constant 0 : index
    %c0_3 = arith.constant 0 : index
    %c0_4 = arith.constant 0 : index
    %1 = vector.load %arg3[%c0_2, %c0_3, %c0_4] : memref<8x8x32xf32, #tpu.memory_space<vmem>>, vector<8x8x32xf32>
    %c0_5 = arith.constant 0 : index
    %c0_6 = arith.constant 0 : index
    %c0_7 = arith.constant 0 : index
    %2 = vector.load %arg4[%c0_5, %c0_6, %c0_7] : memref<8x8x32xf32, #tpu.memory_space<vmem>>, vector<8x8x32xf32>
    "tpu.trace_start"() <{level = 10 : i32, message = "xyd,xsd->xys"}> : () -> ()
    %cst = arith.constant dense<0.000000e+00> : vector<8x8x8xf32>
    %3 = tpu.matmul %0, %2, %cst {dimension_numbers = #tpu.dot_dimension_numbers<[2], [2], [1], [1], [0, 0, 0, 1, 1, 1], [0], [0]>} : vector<8x8x32xf32>, vector<8x8x32xf32>, vector<8x8x8xf32> -> vector<8x8x8xf32>
    "tpu.trace_stop"() : () -> ()
    %4 = vector.shape_cast %0 : vector<8x8x32xf32> to vector<8x8x1x32xf32>
    %5 = vector.shape_cast %1 : vector<8x8x32xf32> to vector<1x8x8x32xf32>
    %6 = vector.broadcast %4 : vector<8x8x1x32xf32> to vector<8x8x8x32xf32>
    %7 = vector.broadcast %5 : vector<1x8x8x32xf32> to vector<8x8x8x32xf32>
    %8 = arith.mulf %6, %7 : vector<8x8x8x32xf32>
    %cst_8 = arith.constant dense<0.000000e+00> : vector<8x8x8xf32>
    %9 = vector.multi_reduction <add>, %8, %cst_8 [3] : vector<8x8x8x32xf32> to vector<8x8x8xf32>
    %10 = vector.shape_cast %9 : vector<8x8x8xf32> to vector<8x8x1x8xf32>
    %11 = vector.shape_cast %10 : vector<8x8x1x8xf32> to vector<8x8x1x8xf32>
    %12 = vector.broadcast %11 : vector<8x8x1x8xf32> to vector<8x8x8x8xf32>
    %c0_9 = arith.constant 0 : index
    %c0_10 = arith.constant 0 : index
    %c0_11 = arith.constant 0 : index
    %c0_12 = arith.constant 0 : index
    %13 = vector.load %arg5[%c0_9, %c0_10, %c0_11, %c0_12] : memref<8x8x8x8xf32, #tpu.memory_space<vmem>>, vector<8x8x8x8xf32>
    tpu.vector_store %arg5[%c0_9, %c0_10, %c0_11, %c0_12], %12 {strides = array<i32>} : memref<8x8x8x8xf32, #tpu.memory_space<vmem>>, vector<8x8x8x8xf32>,
    %14 = vector.shape_cast %3 : vector<8x8x8xf32> to vector<8x8x8x1xf32>
    %15 = vector.shape_cast %14 : vector<8x8x8x1xf32> to vector<8x8x8x1xf32>
    %16 = vector.broadcast %15 : vector<8x8x8x1xf32> to vector<8x8x8x8xf32>
    %c0_13 = arith.constant 0 : index
    %c0_14 = arith.constant 0 : index
    %c0_15 = arith.constant 0 : index
    %c0_16 = arith.constant 0 : index
    %17 = vector.load %arg6[%c0_13, %c0_14, %c0_15, %c0_16] : memref<8x8x8x8xf32, #tpu.memory_space<vmem>>, vector<8x8x8x8xf32>
    tpu.vector_store %arg6[%c0_13, %c0_14, %c0_15, %c0_16], %16 {strides = array<i32>} : memref<8x8x8x8xf32, #tpu.memory_space<vmem>>, vector<8x8x8x8xf32>,
    return
  }
  func.func @transform_0(%arg0: i32, %arg1: i32) -> (i32, i32, i32) {
    %c1_i32 = arith.constant 1 : i32
    %0 = arith.muli %arg0, %c1_i32 : i32
    %1 = arith.addi %0, %arg1 : i32
    %c0_i32 = arith.constant 0 : i32
    %c0_i32_0 = arith.constant 0 : i32
    %c0_i32_1 = arith.constant 0 : i32
    return %1, %c0_i32, %c0_i32_0 : i32, i32, i32
  }
  func.func @transform_1(%arg0: i32, %arg1: i32) -> (i32, i32, i32) {
    %c0_i32 = arith.constant 0 : i32
    %c0_i32_0 = arith.constant 0 : i32
    %c0_i32_1 = arith.constant 0 : i32
    %c0_i32_2 = arith.constant 0 : i32
    return %c0_i32, %c0_i32_0, %c0_i32_1 : i32, i32, i32
  }
  func.func @transform_2(%arg0: i32, %arg1: i32) -> (i32, i32, i32) {
    %c0_i32 = arith.constant 0 : i32
    %c0_i32_0 = arith.constant 0 : i32
    %c0_i32_1 = arith.constant 0 : i32
    return %arg1, %c0_i32, %c0_i32_0 : i32, i32, i32
  }
  func.func @transform_3(%arg0: i32, %arg1: i32) -> (i32, i32, i32, i32) {
    %c1_i32 = arith.constant 1 : i32
    %0 = arith.muli %arg0, %c1_i32 : i32
    %1 = arith.addi %0, %arg1 : i32
    %c0_i32 = arith.constant 0 : i32
    %c0_i32_0 = arith.constant 0 : i32
    %c0_i32_1 = arith.constant 0 : i32
    %c0_i32_2 = arith.constant 0 : i32
    return %1, %c0_i32, %c0_i32_0, %c0_i32_1 : i32, i32, i32, i32
  }
  func.func @transform_4(%arg0: i32, %arg1: i32) -> (i32, i32, i32, i32) {
    %c1_i32 = arith.constant 1 : i32
    %0 = arith.muli %arg0, %c1_i32 : i32
    %1 = arith.addi %0, %arg1 : i32
    %c0_i32 = arith.constant 0 : i32
    %c0_i32_0 = arith.constant 0 : i32
    %c0_i32_1 = arith.constant 0 : i32
    %c0_i32_2 = arith.constant 0 : i32
    return %1, %c0_i32, %c0_i32_0, %c0_i32_1 : i32, i32, i32, i32
  }
}

</mosaic_0001>

<bundles_post_ra>
// kernel: tpu_custom_call.1
= control target key start
LH: loop header
LB: loop body
LE: loop exit
PB: predicated region body
PF: predicated region fallthrough
CT: control target
= control target key end

     0   :  { %10 = vsyncpa [#allocation3], 0  ;;  %s3328_s0 = inlined_call_operand.hbm [shape: f32[32,8,32], index: 0, kind: input, shape index: {}]   ;;  %s3329_s1 = inlined_call_operand.hbm [shape: f32[8,8,32], index: 1, kind: input, shape index: {}]   ;;  %s3330_s2 = inlined_call_operand.hbm [shape: f32[8,8,32], index: 2, kind: input, shape index: {}]   ;;  %s3331_s3 = inlined_call_operand.vmem [shape: f32[32,8,8,8], index: 3, kind: output, shape index: {0}]   ;;  %s3332_s4 = inlined_call_operand.vmem [shape: f32[32,8,8,8], index: 4, kind: output, shape index: {1}]  }
   0x1   :  { %12 = vsyncpa [#allocation3 + $0x1], 0 }
   0x2   :  { %13 = vsyncpa [#allocation5], 0  ;;  %s2580_s15 = smov 0   ;;  %s2582_s16 = smov 0  }
   0x3   :  { %s2584_s17 = smov 0   ;;  %s2586_s18 = smov 0  }
   0x4   :  { %s2588_s19 = smov 0   ;;  %s2590_s20 = smov 0  }
   0x5 LB: > { %s2284_s21 = sadd.s32 4294967295, %s2549_s20   ;;  %p53_p0 = scmp.ne.s32.totalorder %s2533_s16, %s2529_s15  ;;  %s2549_s20 = sphi %s2590_s20, %s19_s20   ;;  %s2545_s19 = sphi %s2588_s19, %s3341_s19   ;;  %s2541_s18 = sphi %s2586_s18, %s3340_s18   ;;  %s2537_s17 = sphi %s2584_s17, %s3339_s17   ;;  %s2533_s16 = sphi %s2582_s16, %s3338_s16   ;;  %s2529_s15 = sphi %s2580_s15, %s3337_s15  }
   0x6   : > { %p2610_p1 = scmp.eq.s32.totalorder %s2284_s21, 0  ;;  %p2286_p2 = scmp.ge.s32.totalorder %s2549_s20, 1 }
   0x7   : > { %p167_p3 = scmp.lt.s32.totalorder %s2549_s20, 5  ;;  %s178_s26 = sshll.u32 %s3329_s1, 4  ;;  %s179_s26 = int_to_ptr.hbm [resolvable:$true] %s178_s26 }
   0x8   : > { %p2618_p4 = por %p2610_p1, %p53_p0  ;;  %s2551_s28 = smov [#allocation4]  }
   0x9   : > { %p2625_p5 = pnand %p2286_p2, %p167_p3  ;;  %s180_s29 = sshll.u32 %s2551_s28, 4  ;;  %s181_s29 = int_to_ptr.vmem [resolvable:$true] %s180_s29 }
   0xa   : > { %s195_s6 = sshll.u32 %s3330_s2, 4  ;;  %s2552_s7 = smov 128   ;;  %s196_s6 = int_to_ptr.hbm [resolvable:$true] %s195_s6 }
   0xb   : > { %p2334_p6 = pneg %p2625_p5  ;;  %s2553_s8 = smov 8  }
   0xc   : > { %s2554_s9 = smov [#allocation6]   ;;  %s31_s11 = sadd.s32 1, %s2545_s19 }
   0xd   : > { %p2335_p7 = pnand %p2334_p6, %p2610_p1  ;;  %s197_s10 = sshll.u32 %s2554_s9, 4  ;;  %s198_s10 = int_to_ptr.vmem [resolvable:$true] %s197_s10 }
   0xe   : > { %s40_s12 = sadd.s32 1, %s2537_s17  ;;  %p33_p8 = scmp.ge.s32.totalorder %s31_s11, 4 }
   0xf   : > { %2337 = dma.hbm_to_vmem [thread:$0]  (!%p2335_p7), %s179_s26, 1024, %s181_s29, [#allocation5], %s2552_s7, %s2552_s7, %s2553_s8  }
  0x10   : > { %2340 = dma.hbm_to_vmem [thread:$0]  (!%p2335_p7), %s196_s6, 1024, %s198_s10, [#allocation5], %s2552_s7, %s2552_s7, %s2553_s8  }
  0x11   : > { %p47_p9 = scmp.ne.s32.totalorder %s2537_s17, %s2533_s16  ;;  %p48_p10 = scmp.eq.s32.totalorder %s2549_s20, 0 }
  0x12   : > { %p2347_p11 = scmp.lt.s32.totalorder %s2549_s20, 4  ;;  %s3343_s11 = smov (%p33_p8, %s31_s11), 0 }
  0x13   : > { %p2650_p12 = por %p48_p10, %p47_p9  ;;  %s211_s14 = sand.u32 1, %s2537_s17  }
  0x14   : > { %s37_s15 = ssub.s32 %s2545_s19, %s3343_s11  ;;  %s2290_s21 = sshll.u32 %s211_s14, 6 }
  0x15   : > { %p38_p13 = scmp.eq.s32.totalorder %s37_s15, 0  ;;  %s2321_s24 = sshll.u32 %s2545_s19, 6 }
  0x16   : > { %s221_s29 = scalar_lea.hbm %s3328_s0, %s2321_s24  ;;  %s215_s30 = scalar_lea.vmem [#allocation2], %s2290_s21 }
  0x17   : > { %s2659_s25 = scalar_select %p38_p13, %s2537_s17, %s40_s12  }
  0x18   : > { %s224_s5 = sshll.u32 %s215_s30, 4  ;;  %s222_s6 = sshll.u32 %s221_s29, 4  ;;  %s225_s5 = int_to_ptr.vmem [resolvable:$true] %s224_s5  ;;  %s223_s6 = int_to_ptr.hbm [resolvable:$true] %s222_s6 }
  0x19   : > { %p2342_p0 = pnand %p2347_p11, %p2650_p12  ;;  %s212_s9 = scalar_lea.sflag [#allocation3], %s211_s14 }
  0x1a   : > { %236 = sbr.rel (%p2625_p5) target bundleno = 511 (0x1ff), region = 32  ;;  %s238_s10 = sand.u32 (!%p2625_p5), 1, %s2533_s16  }
  0x1b   : > { %2344 = dma.hbm_to_vmem [thread:$0]  (!%p2342_p0), %s223_s6, 1024, %s225_s5, %s212_s9, %s2552_s7, %s2552_s7, %s2553_s8  }
  0x1c   : > { %s2294_s12 = sshll.u32 (!%p2625_p5), %s238_s10, 6  ;;  %s239_s15 = scalar_lea.sflag (!%p2625_p5), [#allocation3], %s238_s10 }
  0x1d   : > { %s2674_s21 = scalar_lea.vmem (!%p2625_p5), [#allocation2], %s2294_s12 }
  0x1f   : > { %2520 = dma.done.wait (%p2618_p4), %s239_s15, 1024  }
  0x20   : > { %2522 = vsyncadd (%p2618_p4), %s239_s15, 4294966272 }
  0x21   : > { %2524 = dma.done.wait (%p2610_p1), [#allocation5], 2048  }
  0x22   : > { %2526 = vsyncadd (%p2610_p1), [#allocation5], 4294965248  ;;  %v2685_v0 = vld [vmem:[%s2674_s21] sm:$0xff]  ;;  %vm332_vm0 = vcmask 261120   ;;  %v2695_v7 = vld [vmem:[#allocation4 + $0x10] sm:$0xff]  ;;  %s2297_s22 = sshll.u32 %s2541_s18, 3 }
  0x23   : > { %v2687_v1 = vld [vmem:[#allocation4] sm:$0xff]  ;;  %v597_v2 = vperm.slane %v2685_v0, 0  ;;  %v544_v3 = vrot.slane %v2685_v0, 4  ;;  %v542_v4 = vrot.slane %v2685_v0, 2  ;;  %v541_v5 = vrot.slane %v2685_v0, 1  ;;  %v2700_v14 = vld [vmem:[#allocation4 + $0x8] sm:$0xff] }
  0x24   : > { %v2693_v6 = vld [vmem:[#allocation4 + $0x20] sm:$0xff]  ;;  %v545_v8 = vrot.slane %v2685_v0, 5  ;;  %v543_v9 = vrot.slane %v2685_v0, 3  ;;  %v2705_v20 = vld [vmem:[#allocation4 + $0x28] sm:$0xff]  ;;  %v2707_v21 = vld [vmem:[#allocation4 + $0x18] sm:$0xff]  ;;  %v546_v25 = vrot.slane %v2685_v0, 6 }
  0x25   : > { %v725_v10 = vmul.f32 %v597_v2, %v2687_v1  ;;  %v601_v11 = vperm.slane %v544_v3, 0  ;;  %v599_v12 = vperm.slane %v542_v4, 0  ;;  %v598_v13 = vperm.slane %v541_v5, 0  ;;  %v2717_v29 = vld [vmem:[%s2674_s21 + $0x8] sm:$0xff]  ;;  %v2720_v32 = vld [vmem:[#allocation4 + $0x30] sm:$0xff]  ;;  %v2725_v37 = vld [vmem:[#allocation4 + $0x38] sm:$0xff] }
  0x26   : > { %v602_v15 = vperm.slane %v545_v8, 0  ;;  %v600_v19 = vperm.slane %v543_v9, 0  ;;  %v547_v28 = vrot.slane %v2685_v0, 7  ;;  %v603_v31 = vperm.slane %v546_v25, 0  ;;  %v324_v52 = vld [vmem:[#allocation6] sm:$0xff]  ;;  %v310_v63 = vld [vmem:[%s2674_s21 + $0x10] sm:$0xff] }
  0x27   : > { %v789_v16 = vsel %vm332_vm0, %v725_v10, 0.0  ;;  %v729_v17 = vmul.f32 %v601_v11, %v2693_v6  ;;  %v727_v18 = vmul.f32 %v599_v12, %v2695_v7  ;;  %v726_v24 = vmul.f32 %v598_v13, %v2700_v14  ;;  %2303 = vmatpush.xpose.msk.msra.mxu0 %vm332_vm0, %v324_v52  ;;  %p292_p1 = scmp.lt.s32.totalorder %s2297_s22, 31 }
  0x28   : > { %790 = vadd.xlane.f32.xlu0 %v789_v16  ;;  %v730_v26 = vmul.f32 %v602_v15, %v2705_v20  ;;  %v728_v27 = vmul.f32 %v600_v19, %v2707_v21  ;;  %v605_v35 = vperm.slane %v2717_v29, 0  ;;  %v604_v36 = vperm.slane %v547_v28, 0  ;;  %v325_v15 = vld [vmem:[#allocation6 + $0x8] sm:$0xff] }
  0x29   : > { %v801_v22 = vsel %vm332_vm0, %v729_v17, 0.0  ;;  %v795_v23 = vsel %vm332_vm0, %v727_v18, 0.0  ;;  %v792_v30 = vsel %vm332_vm0, %v726_v24, 0.0  ;;  %v731_v38 = vmul.f32 %v603_v31, %v2720_v32  ;;  %2305 = vmatpush.xpose.msk.msra.mxu1 %vm332_vm0, %v325_v15  ;;  %v2791_v15 = vld [vmem:[%s2674_s21 + $0x20] sm:$0xff]  ;;  %s3345_s22 = smov (!%p292_p1, %s2297_s22), 31 }
  0x2a   : > { %802 = vadd.xlane.f32.xlu2 %v801_v22  ;;  %796 = vadd.xlane.f32.xlu1 %v795_v23  ;;  %v804_v33 = vsel %vm332_vm0, %v730_v26, 0.0  ;;  %v798_v34 = vsel %vm332_vm0, %v728_v27, 0.0  ;;  %v548_v39 = vrot.slane %v2717_v29, 1  ;;  %v733_v40 = vmul.f32 %v605_v35, %v2687_v1  ;;  %s2322_s18 = sshll.u32 %s3345_s22, 6 }
  0x2b   : > { %v732_v41 = vmul.f32 %v604_v36, %v2725_v37  ;;  %v550_v42 = vrot.slane %v2717_v29, 3  ;;  %v549_v43 = vrot.slane %v2717_v29, 2  ;;  %v807_v44 = vsel %vm332_vm0, %v731_v38, 0.0  ;;  %2304 = vmatmul.msk.f32.vlgmr.msra.gmra.mxu0 %vm332_vm0, %v2685_v0  ;;  %s2870_s7 = scalar_lea.vmem %s3331_s3, %s2322_s18  ;;  %s3165_s14 = scalar_lea.vmem %s3332_s4, %s2322_s18 }
  0x2c   : > { %v606_v45 = vperm.slane %v548_v39, 0  ;;  %v813_v46 = vsel %vm332_vm0, %v733_v40, 0.0  ;;  %v551_v51 = vrot.slane %v2717_v29, 4  ;;  %v553_v55 = vrot.slane %v2717_v29, 6  ;;  %2306 = vmatmul.msk.f32.vlgmr.msra.gmra.mxu1 %vm332_vm0, %v2717_v29 }
  0x2d   : > { %v810_v47 = vsel %vm332_vm0, %v732_v41, 0.0  ;;  %v608_v48 = vperm.slane %v550_v42, 0  ;;  %v607_v49 = vperm.slane %v549_v43, 0  ;;  %v552_v56 = vrot.slane %v2717_v29, 5 }
  0x2e   : > { %v734_v50 = vmul.f32 %v606_v45, %v2700_v14  ;;  %v609_v58 = vperm.slane %v551_v51, 0  ;;  %v611_v61 = vperm.slane %v553_v55, 0  ;;  %v554_v3 = vrot.slane %v2717_v29, 7 }
  0x2f   : > { %v736_v53 = vmul.f32 %v608_v48, %v2707_v21  ;;  %v735_v54 = vmul.f32 %v607_v49, %v2695_v7  ;;  %v610_v62 = vperm.slane %v552_v56, 0  ;;  %v555_v8 = vrot.slane %v310_v63, 1 }
  0x30   : > { %793 = vadd.xlane.f32.xlu0 %v792_v30  ;;  %v816_v57 = vsel %vm332_vm0, %v734_v50, 0.0  ;;  %v737_v2 = vmul.f32 %v609_v58, %v2693_v6  ;;  %v739_v4 = vmul.f32 %v611_v61, %v2720_v32  ;;  %v612_v9 = vperm.slane %v554_v3, 0 }
  0x31   : > { %v822_v59 = vsel %vm332_vm0, %v736_v53, 0.0  ;;  %v819_v60 = vsel %vm332_vm0, %v735_v54, 0.0  ;;  %v738_v5 = vmul.f32 %v610_v62, %v2705_v20  ;;  %v614_v12 = vperm.slane %v555_v8, 0 }
  0x32   : > { %805 = vadd.xlane.f32.xlu2 %v804_v33  ;;  %799 = vadd.xlane.f32.xlu1 %v798_v34  ;;  %v825_v0 = vsel %vm332_vm0, %v737_v2, 0.0  ;;  %v831_v10 = vsel %vm332_vm0, %v739_v4, 0.0  ;;  %v613_v13 = vperm.slane %v310_v63, 0  ;;  %v740_v16 = vmul.f32 %v612_v9, %v2725_v37 }
  0x33   : > { %v828_v11 = vsel %vm332_vm0, %v738_v5, 0.0  ;;  %v556_v17 = vrot.slane %v310_v63, 2  ;;  %v742_v18 = vmul.f32 %v614_v12, %v2700_v14  ;;  %v558_v22 = vrot.slane %v310_v63, 4 }
  0x34   : > { %v741_v19 = vmul.f32 %v613_v13, %v2687_v1  ;;  %v557_v23 = vrot.slane %v310_v63, 3  ;;  %v834_v24 = vsel %vm332_vm0, %v740_v16, 0.0  ;;  %v559_v33 = vrot.slane %v310_v63, 5 }
  0x35   : > { %v615_v25 = vperm.slane %v556_v17, 0  ;;  %v840_v26 = vsel %vm332_vm0, %v742_v18, 0.0  ;;  %v617_v28 = vperm.slane %v558_v22, 0  ;;  %v561_v35 = vrot.slane %v310_v63, 7 }
  0x36   : > { %v837_v27 = vsel %vm332_vm0, %v741_v19, 0.0  ;;  %v616_v30 = vperm.slane %v557_v23, 0  ;;  %v560_v36 = vrot.slane %v310_v63, 6  ;;  %v618_v39 = vperm.slane %v559_v33, 0 }
  0x37   : > { %v743_v31 = vmul.f32 %v615_v25, %v2695_v7  ;;  %v745_v34 = vmul.f32 %v617_v28, %v2693_v6  ;;  %v620_v42 = vperm.slane %v561_v35, 0  ;;  %v629_v22 = vperm.slane %v2791_v15, 0 }
  0x38   : > { %808 = vadd.xlane.f32.xlu0 %v807_v44  ;;  %v744_v29 = vmul.f32 %v616_v30, %v2707_v21  ;;  %v619_v43 = vperm.slane %v560_v36, 0  ;;  %v311_v44 = vld [vmem:[%s2674_s21 + $0x18] sm:$0xff]  ;;  %v746_v45 = vmul.f32 %v618_v39, %v2705_v20  ;;  %v569_v25 = vrot.slane %v2791_v15, 1 }
  0x39   : > { %v843_v38 = vsel %vm332_vm0, %v743_v31, 0.0  ;;  %v849_v40 = vsel %vm332_vm0, %v745_v34, 0.0  ;;  %v563_v49 = vrot.slane %v311_v44, 2  ;;  %v562_v50 = vrot.slane %v311_v44, 1 }
  0x3a   : > { %814 = vadd.xlane.f32.xlu2 %v813_v46  ;;  %811 = vadd.xlane.f32.xlu1 %v810_v47  ;;  %v846_v41 = vsel %vm332_vm0, %v744_v29, 0.0  ;;  %v326_v46 = vld [vmem:[#allocation6 + $0x10] sm:$0xff]  ;;  %v748_v47 = vmul.f32 %v620_v42, %v2725_v37  ;;  %v747_v48 = vmul.f32 %v619_v43, %v2720_v32  ;;  %v852_v51 = vsel %vm332_vm0, %v746_v45, 0.0 }
  0x3b   : > { %2307 = vmatpush.xpose.msk.msra.mxu2 %vm332_vm0, %v326_v46  ;;  %v621_v52 = vperm.slane %v311_v44, 0  ;;  %v623_v55 = vperm.slane %v563_v49, 0  ;;  %v622_v56 = vperm.slane %v562_v50, 0  ;;  %v564_v58 = vrot.slane %v311_v44, 3  ;;  %v2817_v50 = vld [vmem:[%s2674_s21 + $0x28] sm:$0xff] }
  0x3c   : > { %v858_v53 = vsel %vm332_vm0, %v748_v47, 0.0  ;;  %v855_v54 = vsel %vm332_vm0, %v747_v48, 0.0  ;;  %v566_v61 = vrot.slane %v311_v44, 5  ;;  %v565_v62 = vrot.slane %v311_v44, 4 }
  0x3d   : > { %v624_v2 = vperm.slane %v564_v58, 0  ;;  %v567_v9 = vrot.slane %v311_v44, 6  ;;  %v568_v13 = vrot.slane %v311_v44, 7  ;;  %v571_v28 = vrot.slane %v2791_v15, 3 }
  0x3e   : > { %2308 = vmatmul.msk.f32.vlgmr.msra.gmra.mxu2 %vm332_vm0, %v310_v63  ;;  %v626_v5 = vperm.slane %v566_v61, 0  ;;  %v625_v8 = vperm.slane %v565_v62, 0  ;;  %v570_v30 = vrot.slane %v2791_v15, 2  ;;  %v630_v33 = vperm.slane %v569_v25, 0 }
  0x3f   : > { %v627_v17 = vperm.slane %v567_v9, 0  ;;  %v628_v23 = vperm.slane %v568_v13, 0  ;;  %v632_v35 = vperm.slane %v571_v28, 0  ;;  %v572_v39 = vrot.slane %v2791_v15, 4 }
  0x40   : > { %817 = vadd.xlane.f32.xlu0 %v816_v57  ;;  %v749_v57 = vmul.f32 %v621_v52, %v2687_v1  ;;  %v753_v12 = vmul.f32 %v625_v8, %v2693_v6  ;;  %v631_v36 = vperm.slane %v570_v30, 0  ;;  %v574_v42 = vrot.slane %v2791_v15, 6 }
  0x41   : > { %v573_v43 = vrot.slane %v2791_v15, 5  ;;  %v633_v45 = vperm.slane %v572_v39, 0  ;;  %v575_v52 = vrot.slane %v2791_v15, 7  ;;  %v637_v61 = vperm.slane %v2817_v50, 0 }
  0x42   : > { %823 = vadd.xlane.f32.xlu2 %v822_v59  ;;  %820 = vadd.xlane.f32.xlu1 %v819_v60  ;;  %v751_v59 = vmul.f32 %v623_v55, %v2695_v7  ;;  %v750_v60 = vmul.f32 %v622_v56, %v2700_v14  ;;  %v861_v63 = vsel %vm332_vm0, %v749_v57, 0.0  ;;  %v873_v19 = vsel %vm332_vm0, %v753_v12, 0.0 }
  0x43   : > { %v635_v48 = vperm.slane %v574_v42, 0  ;;  %v634_v49 = vperm.slane %v573_v43, 0  ;;  %v576_v55 = vrot.slane %v2817_v50, 1  ;;  %v636_v57 = vperm.slane %v575_v52, 0 }
  0x44   : > { %v867_v3 = vsel %vm332_vm0, %v751_v59, 0.0  ;;  %v864_v4 = vsel %vm332_vm0, %v750_v60, 0.0  ;;  %v578_v8 = vrot.slane %v2817_v50, 3  ;;  %v1045_v25 = vlaneseq }
  0x45   : > { %v638_v60 = vperm.slane %v576_v55, 0  ;;  %v764_v62 = vmul.f32 %v636_v57, %v2725_v37  ;;  %vm1565_vm1 = vcmask 64512  }
  0x46   : > { %v640_v13 = vperm.slane %v578_v8, 0 }
  0x48   : > { %826 = vadd.xlane.f32.xlu0 %v825_v0  ;;  %v752_v0 = vmul.f32 %v624_v2, %v2707_v21  ;;  %v328_v2 = vld [vmem:[#allocation6 + $0x20] sm:$0xff] }
  0x49   : > { %2311 = vmatpush.xpose.msk.msrb.mxu0 %vm332_vm0, %v328_v2 }
  0x4a   : > { %832 = vadd.xlane.f32.xlu2 %v831_v10  ;;  %829 = vadd.xlane.f32.xlu1 %v828_v11  ;;  %v327_v10 = vld [vmem:[#allocation6 + $0x18] sm:$0xff]  ;;  %v754_v11 = vmul.f32 %v626_v5, %v2705_v20  ;;  %v870_v16 = vsel %vm332_vm0, %v752_v0, 0.0  ;;  %v579_v5 = vrot.slane %v2817_v50, 4  ;;  %v906_v0 = vsel %vm332_vm0, %v764_v62, 0.0 }
  0x4b   : > { %2309 = vmatpush.xpose.msk.msra.mxu3 %vm332_vm0, %v327_v10 }
  0x4c   : > { %v876_v18 = vsel %vm332_vm0, %v754_v11, 0.0  ;;  %2312 = vmatmul.msk.f32.vlgmr.msrb.gmra.mxu0 %vm332_vm0, %v2791_v15  ;;  %v641_v12 = vperm.slane %v579_v5, 0  ;;  %v768_v15 = vmul.f32 %v640_v13, %v2707_v21 }
  0x4e   : > { %2310 = vmatmul.msk.f32.vlgmr.msra.gmra.mxu3 %vm332_vm0, %v311_v44 }
  0x50   : > { %835 = vadd.xlane.f32.xlu0 %v834_v24  ;;  %v755_v24 = vmul.f32 %v627_v17, %v2720_v32  ;;  %v580_v17 = vrot.slane %v2817_v50, 5 }
  0x52   : > { %841 = vadd.xlane.f32.xlu2 %v840_v26  ;;  %838 = vadd.xlane.f32.xlu1 %v837_v27  ;;  %v757_v26 = vmul.f32 %v629_v22, %v2687_v1  ;;  %v756_v27 = vmul.f32 %v628_v23, %v2725_v37  ;;  %v879_v31 = vsel %vm332_vm0, %v755_v24, 0.0  ;;  %v581_v22 = vrot.slane %v2817_v50, 6 }
  0x53   : > { %v642_v24 = vperm.slane %v580_v17, 0 }
  0x54   : > { %v885_v34 = vsel %vm332_vm0, %v757_v26, 0.0  ;;  %v882_v29 = vsel %vm332_vm0, %v756_v27, 0.0  ;;  %v918_v27 = vsel %vm332_vm0, %v768_v15, 0.0  ;;  %v643_v30 = vperm.slane %v581_v22, 0  ;;  %v2913_v15 = vld [vmem:[%s2674_s21 + $0x38] sm:$0xff] }
  0x58   : > { %844 = vadd.xlane.f32.xlu0 %v843_v38  ;;  %v758_v38 = vmul.f32 %v630_v33, %v2700_v14  ;;  %v770_v33 = vmul.f32 %v642_v24, %v2705_v20 }
  0x5a   : > { %850 = vadd.xlane.f32.xlu2 %v849_v40  ;;  %847 = vadd.xlane.f32.xlu1 %v846_v41  ;;  %v760_v40 = vmul.f32 %v632_v35, %v2707_v21  ;;  %v759_v41 = vmul.f32 %v631_v36, %v2695_v7  ;;  %v888_v44 = vsel %vm332_vm0, %v758_v38, 0.0  ;;  %v771_v35 = vmul.f32 %v643_v30, %v2720_v32 }
  0x5b   : > { %v924_v43 = vsel %vm332_vm0, %v770_v33, 0.0  ;;  %v653_v33 = vperm.slane %v2913_v15, 0 }
  0x5c   : > { %v894_v46 = vsel %vm332_vm0, %v760_v40, 0.0  ;;  %v891_v47 = vsel %vm332_vm0, %v759_v41, 0.0 }
  0x60   : > { %853 = vadd.xlane.f32.xlu0 %v852_v51  ;;  %v761_v51 = vmul.f32 %v633_v45, %v2693_v6 }
  0x62   : > { %859 = vadd.xlane.f32.xlu2 %v858_v53  ;;  %856 = vadd.xlane.f32.xlu1 %v855_v54  ;;  %v763_v53 = vmul.f32 %v635_v48, %v2720_v32  ;;  %v762_v54 = vmul.f32 %v634_v49, %v2705_v20  ;;  %v897_v56 = vsel %vm332_vm0, %v761_v51, 0.0  ;;  %v927_v48 = vsel %vm332_vm0, %v771_v35, 0.0 }
  0x64   : > { %v903_v58 = vsel %vm332_vm0, %v763_v53, 0.0  ;;  %v900_v59 = vsel %vm332_vm0, %v762_v54, 0.0  ;;  %v329_v54 = vld [vmem:[#allocation6 + $0x28] sm:$0xff] }
  0x65   : > { %2313 = vmatpush.xpose.msk.msrb.mxu1 %vm332_vm0, %v329_v54  ;;  %v593_v54 = vrot.slane %v2913_v15, 4 }
  0x68   : > { %862 = vadd.xlane.f32.xlu0 %v861_v63  ;;  %v577_v63 = vrot.slane %v2817_v50, 2  ;;  %2314 = vmatmul.msk.f32.vlgmr.msrb.gmra.mxu1 %vm332_vm0, %v2817_v50 }
  0x6a   : > { %868 = vadd.xlane.f32.xlu2 %v867_v3  ;;  %865 = vadd.xlane.f32.xlu1 %v864_v4  ;;  %v766_v3 = vmul.f32 %v638_v60, %v2700_v14  ;;  %v765_v4 = vmul.f32 %v637_v61, %v2687_v1  ;;  %v639_v9 = vperm.slane %v577_v63, 0 }
  0x6c   : > { %v912_v10 = vsel %vm332_vm0, %v766_v3, 0.0  ;;  %v909_v11 = vsel %vm332_vm0, %v765_v4, 0.0 }
  0x70   : > { %871 = vadd.xlane.f32.xlu0 %v870_v16  ;;  %v767_v16 = vmul.f32 %v639_v9, %v2695_v7 }
  0x72   : > { %877 = vadd.xlane.f32.xlu2 %v876_v18  ;;  %874 = vadd.xlane.f32.xlu1 %v873_v19  ;;  %v769_v18 = vmul.f32 %v641_v12, %v2693_v6  ;;  %v582_v19 = vrot.slane %v2817_v50, 7  ;;  %v915_v23 = vsel %vm332_vm0, %v767_v16, 0.0  ;;  %v330_v50 = vld [vmem:[#allocation6 + $0x30] sm:$0xff] }
  0x73   : > { %2315 = vmatpush.xpose.msk.msrb.mxu2 %vm332_vm0, %v330_v50 }
  0x74   : > { %v921_v26 = vsel %vm332_vm0, %v769_v18, 0.0  ;;  %v644_v28 = vperm.slane %v582_v19, 0 }
  0x78   : > { %880 = vadd.xlane.f32.xlu0 %v879_v31  ;;  %v2853_v31 = vld [vmem:[%s2674_s21 + $0x30] sm:$0xff] }
  0x79   : > { %v584_v38 = vrot.slane %v2853_v31, 2  ;;  %v583_v39 = vrot.slane %v2853_v31, 1  ;;  %v585_v53 = vrot.slane %v2853_v31, 3  ;;  %v589_v17 = vrot.slane %v2853_v31, 7  ;;  %2316 = vmatmul.msk.f32.vlgmr.msrb.gmra.mxu2 %vm332_vm0, %v2853_v31 }
  0x7a   : > { %886 = vadd.xlane.f32.xlu2 %v885_v34  ;;  %883 = vadd.xlane.f32.xlu1 %v882_v29  ;;  %v2858_v34 = vand.u32 127, %v1045_v25  ;;  %v772_v29 = vmul.f32 %v644_v28, %v2725_v37 }
  0x7b   : > { %v647_v49 = vperm.slane %v584_v38, 0  ;;  %v646_v51 = vperm.slane %v583_v39, 0  ;;  %v648_v2 = vperm.slane %v585_v53, 0 }
  0x7d   : > { %v775_v55 = vmul.f32 %v647_v49, %v2695_v7 }
  0x7f   : > { %v939_v5 = vsel %vm332_vm0, %v775_v55, 0.0  ;;  %v1632_v55 = vshrl.u32 %v1045_v25, 7 }
  0x80   : > { %889 = vadd.xlane.f32.xlu0 %v888_v44  ;;  %v645_v44 = vperm.slane %v2853_v31, 0 }
  0x81   : > { %2403 = vset.pattern.permute.xlu2 %v1632_v55  ;;  %2402 = vset.pattern.permute.xlu1 %v1632_v55 }
  0x82   : > { %895 = vadd.xlane.f32.xlu2 %v894_v46  ;;  %892 = vadd.xlane.f32.xlu1 %v891_v47  ;;  %v930_v47 = vsel %vm332_vm0, %v772_v29, 0.0  ;;  %v773_v52 = vmul.f32 %v645_v44, %v2687_v1  ;;  %v652_v29 = vperm.slane %v589_v17, 0 }
  0x83   : > { %2404 = vset.pattern.permute.xlu0 %v1632_v55 }
  0x84   : > { %v933_v63 = vsel %vm332_vm0, %v773_v52, 0.0  ;;  %v780_v38 = vmul.f32 %v652_v29, %v2725_v37 }
  0x86   : > { %v954_v49 = vsel %vm332_vm0, %v780_v38, 0.0 }
  0x88   : > { %898 = vadd.xlane.f32.xlu0 %v897_v56  ;;  %v774_v56 = vmul.f32 %v646_v51, %v2700_v14 }
  0x8a   : > { %904 = vadd.xlane.f32.xlu2 %v903_v58  ;;  %901 = vadd.xlane.f32.xlu1 %v900_v59  ;;  %v587_v58 = vrot.slane %v2853_v31, 5  ;;  %v586_v59 = vrot.slane %v2853_v31, 4  ;;  %v936_v8 = vsel %vm332_vm0, %v774_v56, 0.0 }
  0x8c   : > { %v649_v9 = vperm.slane %v586_v59, 0  ;;  %v595_v59 = vrot.slane %v2913_v15, 6 }
  0x8e   : > { %v777_v13 = vmul.f32 %v649_v9, %v2693_v6  ;;  %v331_v9 = vld [vmem:[#allocation6 + $0x38] sm:$0xff] }
  0x8f   : > { %2317 = vmatpush.xpose.msk.msrb.mxu3 %vm332_vm0, %v331_v9 }
  0x90   : > { %907 = vadd.xlane.f32.xlu0 %v906_v0  ;;  %v650_v0 = vperm.slane %v587_v58, 0  ;;  %v945_v30 = vsel %vm332_vm0, %v777_v13, 0.0 }
  0x92   : > { %913 = vadd.xlane.f32.xlu2 %v912_v10  ;;  %910 = vadd.xlane.f32.xlu1 %v909_v11  ;;  %v776_v10 = vmul.f32 %v648_v2, %v2707_v21  ;;  %v588_v11 = vrot.slane %v2853_v31, 6  ;;  %v778_v12 = vmul.f32 %v650_v0, %v2705_v20  ;;  %v781_v31 = vmul.f32 %v653_v33, %v2687_v1 }
  0x93   : > { %v596_v0 = vrot.slane %v2913_v15, 7  ;;  %2318 = vmatmul.msk.f32.vlgmr.msrb.gmra.mxu3 %vm332_vm0, %v2913_v15 }
  0x94   : > { %v651_v24 = vperm.slane %v588_v11, 0  ;;  %v948_v28 = vsel %vm332_vm0, %v778_v12, 0.0 }
  0x95   : > { %v660_v17 = vperm.slane %v596_v0, 0 }
  0x96   : > { %v779_v35 = vmul.f32 %v651_v24, %v2720_v32 }
  0x98   : > { %916 = vadd.xlane.f32.xlu0 %v915_v23  ;;  %v942_v23 = vsel %vm332_vm0, %v776_v10, 0.0 }
  0x9a   : > { %922 = vadd.xlane.f32.xlu2 %v921_v26  ;;  %919 = vadd.xlane.f32.xlu1 %v918_v27 }
  0x9b   : > { %v791_v36 = vpop.xlane.xlu0 %790 }
  0x9c   : > { %v1047_v40 = vperm.slane %v791_v36, %v2858_v34  ;;  %v590_v36 = vrot.slane %v2913_v15, 1 }
  0x9d   : > { %v803_v41 = vpop.xlane.xlu2 %802  ;;  %v797_v42 = vpop.xlane.xlu1 %796 }
  0x9e   : > { %v1051_v45 = vperm.slane %v803_v41, %v2858_v34  ;;  %v1049_v46 = vperm.slane %v797_v42, %v2858_v34  ;;  %1566 = vst.msk [vmem:[%s2870_s7] sm:$0xff] %vm1565_vm1, %v1047_v40  ;;  %v592_v40 = vrot.slane %v2913_v15, 3  ;;  %v591_v41 = vrot.slane %v2913_v15, 2 }
  0xa0   : > { %1570 = vst.msk [vmem:[%s2870_s7 + $0x20] sm:$0xff] %vm1565_vm1, %v1051_v45  ;;  %925 = vadd.xlane.f32.xlu0 %v924_v43  ;;  %v951_v45 = vsel %vm332_vm0, %v779_v35, 0.0  ;;  %v656_v51 = vperm.slane %v592_v40, 0  ;;  %v655_v52 = vperm.slane %v591_v41, 0 }
  0xa1   : > { %1568 = vst.msk [vmem:[%s2870_s7 + $0x10] sm:$0xff] %vm1565_vm1, %v1049_v46  ;;  %v654_v46 = vperm.slane %v590_v36, 0 }
  0xa2   : > { %931 = vadd.xlane.f32.xlu2 %v930_v47  ;;  %928 = vadd.xlane.f32.xlu1 %v927_v48  ;;  %v957_v48 = vsel %vm332_vm0, %v781_v31, 0.0  ;;  %v784_v56 = vmul.f32 %v656_v51, %v2707_v21 }
  0xa3   : > { %v794_v57 = vpop.xlane.xlu0 %793  ;;  %v782_v53 = vmul.f32 %v654_v46, %v2700_v14 }
  0xa4   : > { %v1048_v60 = vperm.slane %v794_v57, %v2858_v34  ;;  %v783_v57 = vmul.f32 %v655_v52, %v2695_v7  ;;  %v966_v2 = vsel %vm332_vm0, %v784_v56, 0.0 }
  0xa5   : > { %v806_v61 = vpop.xlane.xlu2 %805  ;;  %v800_v62 = vpop.xlane.xlu1 %799 }
  0xa6   : > { %v1052_v3 = vperm.slane %v806_v61, %v2858_v34  ;;  %v1050_v4 = vperm.slane %v800_v62, %v2858_v34  ;;  %1567 = vst.msk [vmem:[%s2870_s7 + $0x8] sm:$0xff] %vm1565_vm1, %v1048_v60  ;;  %v594_v60 = vrot.slane %v2913_v15, 5  ;;  %v960_v62 = vsel %vm332_vm0, %v782_v53, 0.0 }
  0xa8   : > { %1571 = vst.msk [vmem:[%s2870_s7 + $0x28] sm:$0xff] %vm1565_vm1, %v1052_v3  ;;  %934 = vadd.xlane.f32.xlu0 %v933_v63  ;;  %v657_v63 = vperm.slane %v593_v54, 0  ;;  %v963_v3 = vsel %vm332_vm0, %v783_v57, 0.0  ;;  %v356_v38 = vpop.f32.mrf.mxu0 }
  0xa9   : > { %1569 = vst.msk [vmem:[%s2870_s7 + $0x18] sm:$0xff] %vm1565_vm1, %v1050_v4  ;;  %v659_v4 = vperm.slane %v595_v59, 0  ;;  %v1630_v46 = vperm.slane %v356_v38, 0  ;;  %v1651_v55 = vperm.slane %v356_v38, 3  ;;  %v1658_v57 = vperm.slane %v356_v38, 4 }
  0xaa   : > { %940 = vadd.xlane.f32.xlu2 %v939_v5  ;;  %937 = vadd.xlane.f32.xlu1 %v936_v8  ;;  %v658_v5 = vperm.slane %v594_v60, 0  ;;  %v785_v8 = vmul.f32 %v657_v63, %v2693_v6  ;;  %v1679_v9 = vperm.slane %v356_v38, 7 }
  0xab   : > { %v809_v16 = vpop.xlane.xlu0 %808  ;;  %v787_v10 = vmul.f32 %v659_v4, %v2720_v32 }
  0xac   : > { %v1053_v18 = vperm.slane %v809_v16, %v2858_v34  ;;  %v786_v11 = vmul.f32 %v658_v5, %v2705_v20  ;;  %v969_v6 = vsel %vm332_vm0, %v785_v8, 0.0 }
  0xad   : > { %v815_v19 = vpop.xlane.xlu2 %814  ;;  %v812_v22 = vpop.xlane.xlu1 %811  ;;  %v975_v20 = vsel %vm332_vm0, %v787_v10, 0.0 }
  0xae   : > { %v1055_v26 = vperm.slane %v815_v19, %v2858_v34  ;;  %v1054_v27 = vperm.slane %v812_v22, %v2858_v34  ;;  %1572 = vst.msk [vmem:[%s2870_s7 + $0x30] sm:$0xff] %vm1565_vm1, %v1053_v18  ;;  %v972_v32 = vsel %vm332_vm0, %v786_v11, 0.0  ;;  %v788_v22 = vmul.f32 %v660_v17, %v2725_v37 }
  0xb0   : > { %1574 = vst.msk [vmem:[%s2870_s7 + $0x40] sm:$0xff] %vm1565_vm1, %v1055_v26  ;;  %943 = vadd.xlane.f32.xlu0 %v942_v23 }
  0xb1   : > { %1573 = vst.msk [vmem:[%s2870_s7 + $0x38] sm:$0xff] %vm1565_vm1, %v1054_v27  ;;  %v978_v27 = vsel %vm332_vm0, %v788_v22, 0.0 }
  0xb2   : > { %949 = vadd.xlane.f32.xlu2 %v948_v28  ;;  %946 = vadd.xlane.f32.xlu1 %v945_v30 }
  0xb3   : > { %v818_v39 = vpop.xlane.xlu0 %817 }
  0xb4   : > { %v1056_v42 = vperm.slane %v818_v39, %v2858_v34 }
  0xb5   : > { %v824_v43 = vpop.xlane.xlu2 %823  ;;  %v821_v44 = vpop.xlane.xlu1 %820 }
  0xb6   : > { %v1058_v47 = vperm.slane %v824_v43, %v2858_v34  ;;  %v1057_v1 = vperm.slane %v821_v44, %v2858_v34  ;;  %1575 = vst.msk [vmem:[%s2870_s7 + $0x48] sm:$0xff] %vm1565_vm1, %v1056_v42 }
  0xb8   : > { %1577 = vst.msk [vmem:[%s2870_s7 + $0x58] sm:$0xff] %vm1565_vm1, %v1058_v47  ;;  %952 = vadd.xlane.f32.xlu0 %v951_v45  ;;  %v1637_v45 = vperm.slane %v356_v38, 1  ;;  %v1644_v47 = vperm.slane %v356_v38, 2 }
  0xb9   : > { %1576 = vst.msk [vmem:[%s2870_s7 + $0x50] sm:$0xff] %vm1565_vm1, %v1057_v1 }
  0xba   : > { %958 = vadd.xlane.f32.xlu2 %v957_v48  ;;  %955 = vadd.xlane.f32.xlu1 %v954_v49  ;;  %v3014_v48 = vpop.f32.mrf.mxu1 }
  0xbb   : > { %v827_v58 = vpop.xlane.xlu0 %826  ;;  %v1693_v56 = vperm.slane %v3014_v48, 1  ;;  %v1714_v63 = vperm.slane %v3014_v48, 4  ;;  %v1686_v0 = vperm.slane %v3014_v48, 0  ;;  %v1735_v10 = vperm.slane %v3014_v48, 7 }
  0xbc   : > { %v1059_v14 = vperm.slane %v827_v58, %v2858_v34 }
  0xbd   : > { %v833_v25 = vpop.xlane.xlu2 %832  ;;  %v830_v61 = vpop.xlane.xlu1 %829 }
  0xbe   : > { %v1061_v21 = vperm.slane %v833_v25, %v2858_v34  ;;  %v1060_v7 = vperm.slane %v830_v61, %v2858_v34  ;;  %1578 = vst.msk [vmem:[%s2870_s7 + $0x60] sm:$0xff] %vm1565_vm1, %v1059_v14 }
  0xc0   : > { %1580 = vst.msk [vmem:[%s2870_s7 + $0x70] sm:$0xff] %vm1565_vm1, %v1061_v21  ;;  %961 = vadd.xlane.f32.xlu0 %v960_v62  ;;  %v1665_v62 = vperm.slane %v356_v38, 5  ;;  %v1672_v21 = vperm.slane %v356_v38, 6 }
  0xc1   : > { %1579 = vst.msk [vmem:[%s2870_s7 + $0x68] sm:$0xff] %vm1565_vm1, %v1060_v7 }
  0xc2   : > { %967 = vadd.xlane.f32.xlu2 %v966_v2  ;;  %964 = vadd.xlane.f32.xlu1 %v963_v3 }
  0xc3   : > { %v836_v50 = vpop.xlane.xlu0 %835 }
  0xc4   : > { %v1062_v12 = vperm.slane %v836_v50, %v2858_v34  ;;  %v3047_v50 = vpop.f32.mrf.mxu2 }
  0xc5   : > { %v842_v13 = vpop.xlane.xlu2 %841  ;;  %v839_v16 = vpop.xlane.xlu1 %838 }
  0xc6   : > { %v1064_v18 = vperm.slane %v842_v13, %v2858_v34  ;;  %v1063_v19 = vperm.slane %v839_v16, %v2858_v34  ;;  %1581 = vst.msk [vmem:[%s2870_s7 + $0x78] sm:$0xff] %vm1565_vm1, %v1062_v12 }
  0xc8   : > { %1583 = vst.msk [vmem:[%s2870_s7 + $0x88] sm:$0xff] %vm1565_vm1, %v1064_v18  ;;  %970 = vadd.xlane.f32.xlu0 %v969_v6  ;;  %v1700_v18 = vperm.slane %v3014_v48, 2 }
  0xc9   : > { %1582 = vst.msk [vmem:[%s2870_s7 + $0x80] sm:$0xff] %vm1565_vm1, %v1063_v19  ;;  %v1756_v19 = vperm.slane %v3047_v50, 2 }
  0xca   : > { %976 = vadd.xlane.f32.xlu2 %v975_v20  ;;  %973 = vadd.xlane.f32.xlu1 %v972_v32  ;;  %v1707_v20 = vperm.slane %v3014_v48, 3 }
  0xcb   : > { %v845_v23 = vpop.xlane.xlu0 %844 }
  0xcc   : > { %v1065_v24 = vperm.slane %v845_v23, %v2858_v34 }
  0xcd   : > { %v851_v15 = vpop.xlane.xlu2 %850  ;;  %v848_v26 = vpop.xlane.xlu1 %847 }
  0xce   : > { %v1067_v28 = vperm.slane %v851_v15, %v2858_v34  ;;  %v1066_v30 = vperm.slane %v848_v26, %v2858_v34  ;;  %1584 = vst.msk [vmem:[%s2870_s7 + $0x90] sm:$0xff] %vm1565_vm1, %v1065_v24 }
  0xd0   : > { %1586 = vst.msk [vmem:[%s2870_s7 + $0xa0] sm:$0xff] %vm1565_vm1, %v1067_v28  ;;  %979 = vadd.xlane.f32.xlu0 %v978_v27  ;;  %v1721_v27 = vperm.slane %v3014_v48, 5  ;;  %v1777_v28 = vperm.slane %v3047_v50, 5 }
  0xd1   : > { %1585 = vst.msk [vmem:[%s2870_s7 + $0x98] sm:$0xff] %vm1565_vm1, %v1066_v30  ;;  %v1728_v30 = vperm.slane %v3014_v48, 6 }
  0xd3   : > { %v854_v37 = vpop.xlane.xlu0 %853 }
  0xd4   : > { %v1068_v33 = vperm.slane %v854_v37, %v2858_v34 }
  0xd5   : > { %v860_v29 = vpop.xlane.xlu2 %859  ;;  %v857_v35 = vpop.xlane.xlu1 %856 }
  0xd6   : > { %v1070_v36 = vperm.slane %v860_v29, %v2858_v34  ;;  %v1069_v31 = vperm.slane %v857_v35, %v2858_v34  ;;  %1587 = vst.msk [vmem:[%s2870_s7 + $0xa8] sm:$0xff] %vm1565_vm1, %v1068_v33  ;;  %v3073_v33 = vpop.f32.mrf.mxu3 }
  0xd7   : > { %v1819_v48 = vperm.slane %v3073_v33, 3 }
  0xd8   : > { %1589 = vst.msk [vmem:[%s2870_s7 + $0xb8] sm:$0xff] %vm1565_vm1, %v1070_v36 }
  0xd9   : > { %1588 = vst.msk [vmem:[%s2870_s7 + $0xb0] sm:$0xff] %vm1565_vm1, %v1069_v31 }
  0xdb   : > { %v863_v39 = vpop.xlane.xlu0 %862 }
  0xdc   : > { %v1071_v40 = vperm.slane %v863_v39, %v2858_v34  ;;  %v1742_v39 = vperm.slane %v3047_v50, 0 }
  0xdd   : > { %v869_v41 = vpop.xlane.xlu2 %868  ;;  %v866_v42 = vpop.xlane.xlu1 %865 }
  0xde   : > { %v1073_v43 = vperm.slane %v869_v41, %v2858_v34  ;;  %v1072_v44 = vperm.slane %v866_v42, %v2858_v34  ;;  %1590 = vst.msk [vmem:[%s2870_s7 + $0xc0] sm:$0xff] %vm1565_vm1, %v1071_v40  ;;  %v1749_v40 = vperm.slane %v3047_v50, 1  ;;  %v1798_v41 = vperm.slane %v3073_v33, 0 }
  0xe0   : > { %1592 = vst.msk [vmem:[%s2870_s7 + $0xd0] sm:$0xff] %vm1565_vm1, %v1073_v43 }
  0xe1   : > { %1591 = vst.msk [vmem:[%s2870_s7 + $0xc8] sm:$0xff] %vm1565_vm1, %v1072_v44 }
  0xe2   : > { %1642 = vperm.xlu2 %2403, %v1637_v45  }
  0xe3   : > { %1635 = vperm.xlu1 %2402, %v1630_v46   ;;  %v872_v1 = vpop.xlane.xlu0 %871 }
  0xe4   : > { %1649 = vperm.xlu0 %2404, %v1644_v47   ;;  %v1074_v49 = vperm.slane %v872_v1, %v2858_v34  ;;  %v1763_v1 = vperm.slane %v3047_v50, 3 }
  0xe5   : > { %v878_v51 = vpop.xlane.xlu2 %877  ;;  %v875_v52 = vpop.xlane.xlu1 %874 }
  0xe6   : > { %v1076_v53 = vperm.slane %v878_v51, %v2858_v34  ;;  %v1075_v54 = vperm.slane %v875_v52, %v2858_v34  ;;  %1593 = vst.msk [vmem:[%s2870_s7 + $0xd8] sm:$0xff] %vm1565_vm1, %v1074_v49  ;;  %v1770_v49 = vperm.slane %v3047_v50, 4 }
  0xe8   : > { %1595 = vst.msk [vmem:[%s2870_s7 + $0xe8] sm:$0xff] %vm1565_vm1, %v1076_v53 }
  0xe9   : > { %1594 = vst.msk [vmem:[%s2870_s7 + $0xe0] sm:$0xff] %vm1565_vm1, %v1075_v54 }
  0xea   : > { %1656 = vperm.xlu2 %2403, %v1651_v55  }
  0xeb   : > { %1663 = vperm.xlu1 %2402, %v1658_v57   ;;  %v881_v58 = vpop.xlane.xlu0 %880  ;;  %v1784_v57 = vperm.slane %v3047_v50, 6 }
  0xec   : > { %1698 = vperm.xlu0 %2404, %v1693_v56   ;;  %v1077_v59 = vperm.slane %v881_v58, %v2858_v34  ;;  %v1840_v58 = vperm.slane %v3073_v33, 6 }
  0xed   : > { %v887_v60 = vpop.xlane.xlu2 %886  ;;  %v884_v14 = vpop.xlane.xlu1 %883 }
  0xee   : > { %v1079_v25 = vperm.slane %v887_v60, %v2858_v34  ;;  %v1078_v61 = vperm.slane %v884_v14, %v2858_v34  ;;  %1596 = vst.msk [vmem:[%s2870_s7 + $0xf0] sm:$0xff] %vm1565_vm1, %v1077_v59  ;;  %v1791_v59 = vperm.slane %v3047_v50, 7  ;;  %v3111_v14 = vpop.f32.mrf.mxu0 }
  0xef   : > { %v1882_v50 = vperm.slane %v3111_v14, 4 }
  0xf0   : > { %1598 = vst.msk [vmem:[%s2870_s7 + $0x100] sm:$0xff] %vm1565_vm1, %v1079_v25 }
  0xf1   : > { %1597 = vst.msk [vmem:[%s2870_s7 + $0xf8] sm:$0xff] %vm1565_vm1, %v1078_v61 }
  0xf2   : > { %1670 = vperm.xlu2 %2403, %v1665_v62  }
  0xf3   : > { %1677 = vperm.xlu1 %2402, %v1672_v21   ;;  %v890_v7 = vpop.xlane.xlu0 %889 }
  0xf4   : > { %1719 = vperm.xlu0 %2404, %v1714_v63   ;;  %v1080_v2 = vperm.slane %v890_v7, %v2858_v34  ;;  %v1805_v7 = vperm.slane %v3073_v33, 1 }
  0xf5   : > { %v896_v3 = vpop.xlane.xlu2 %895  ;;  %v893_v4 = vpop.xlane.xlu1 %892 }
  0xf6   : > { %v1082_v5 = vperm.slane %v896_v3, %v2858_v34  ;;  %v1081_v8 = vperm.slane %v893_v4, %v2858_v34  ;;  %1599 = vst.msk [vmem:[%s2870_s7 + $0x108] sm:$0xff] %vm1565_vm1, %v1080_v2  ;;  %v1861_v2 = vperm.slane %v3111_v14, 1  ;;  %v1812_v3 = vperm.slane %v3073_v33, 2 }
  0xf8   : > { %1601 = vst.msk [vmem:[%s2870_s7 + $0x118] sm:$0xff] %vm1565_vm1, %v1082_v5 }
  0xf9   : > { %1600 = vst.msk [vmem:[%s2870_s7 + $0x110] sm:$0xff] %vm1565_vm1, %v1081_v8 }
  0xfa   : > { %1684 = vperm.xlu2 %2403, %v1679_v9  }
  0xfb   : > { %1691 = vperm.xlu1 %2402, %v1686_v0   ;;  %v899_v11 = vpop.xlane.xlu0 %898 }
  0xfc   : > { %1740 = vperm.xlu0 %2404, %v1735_v10   ;;  %v1083_v12 = vperm.slane %v899_v11, %v2858_v34  ;;  %v1826_v11 = vperm.slane %v3073_v33, 4 }
  0xfd   : > { %v905_v13 = vpop.xlane.xlu2 %904  ;;  %v902_v16 = vpop.xlane.xlu1 %901 }
  0xfe   : > { %v1085_v6 = vperm.slane %v905_v13, %v2858_v34  ;;  %v1084_v17 = vperm.slane %v902_v16, %v2858_v34  ;;  %1602 = vst.msk [vmem:[%s2870_s7 + $0x120] sm:$0xff] %vm1565_vm1, %v1083_v12  ;;  %v1833_v12 = vperm.slane %v3073_v33, 5 }
 0x100   : > { %1604 = vst.msk [vmem:[%s2870_s7 + $0x130] sm:$0xff] %vm1565_vm1, %v1085_v6 }
 0x101   : > { %1603 = vst.msk [vmem:[%s2870_s7 + $0x128] sm:$0xff] %vm1565_vm1, %v1084_v17 }
 0x102   : > { %1705 = vperm.xlu2 %2403, %v1700_v18  }
 0x103   : > { %1712 = vperm.xlu1 %2402, %v1707_v20   ;;  %v908_v32 = vpop.xlane.xlu0 %907  ;;  %v1854_v20 = vperm.slane %v3111_v14, 0 }
 0x104   : > { %1761 = vperm.xlu0 %2404, %v1756_v19   ;;  %v1086_v22 = vperm.slane %v908_v32, %v2858_v34  ;;  %v1847_v32 = vperm.slane %v3073_v33, 7 }
 0x105   : > { %v914_v23 = vpop.xlane.xlu2 %913  ;;  %v911_v24 = vpop.xlane.xlu1 %910 }
 0x106   : > { %v1088_v15 = vperm.slane %v914_v23, %v2858_v34  ;;  %v1087_v26 = vperm.slane %v911_v24, %v2858_v34  ;;  %1605 = vst.msk [vmem:[%s2870_s7 + $0x138] sm:$0xff] %vm1565_vm1, %v1086_v22  ;;  %v1903_v22 = vperm.slane %v3111_v14, 7  ;;  %v486_v24 = vpop.f32.mrf.mxu1 }
 0x107   : > { %v1924_v33 = vperm.slane %v486_v24, 2 }
 0x108   : > { %1607 = vst.msk [vmem:[%s2870_s7 + $0x148] sm:$0xff] %vm1565_vm1, %v1088_v15 }
 0x109   : > { %1606 = vst.msk [vmem:[%s2870_s7 + $0x140] sm:$0xff] %vm1565_vm1, %v1087_v26 }
 0x10a   : > { %1726 = vperm.xlu2 %2403, %v1721_v27  }
 0x10b   : > { %1733 = vperm.xlu1 %2402, %v1728_v30   ;;  %v917_v37 = vpop.xlane.xlu0 %916 }
 0x10c   : > { %1782 = vperm.xlu0 %2404, %v1777_v28   ;;  %v1089_v29 = vperm.slane %v917_v37, %v2858_v34  ;;  %v1868_v37 = vperm.slane %v3111_v14, 2 }
 0x10d   : > { %v923_v35 = vpop.xlane.xlu2 %922  ;;  %v920_v36 = vpop.xlane.xlu1 %919 }
 0x10e   : > { %v1091_v31 = vperm.slane %v923_v35, %v2858_v34  ;;  %v1090_v38 = vperm.slane %v920_v36, %v2858_v34  ;;  %1608 = vst.msk [vmem:[%s2870_s7 + $0x150] sm:$0xff] %vm1565_vm1, %v1089_v29  ;;  %v1875_v29 = vperm.slane %v3111_v14, 3 }
 0x110   : > { %1610 = vst.msk [vmem:[%s2870_s7 + $0x160] sm:$0xff] %vm1565_vm1, %v1091_v31 }
 0x111   : > { %1609 = vst.msk [vmem:[%s2870_s7 + $0x158] sm:$0xff] %vm1565_vm1, %v1090_v38  ;;  %v1889_v38 = vperm.slane %v3111_v14, 5 }
 0x112   : > { %1747 = vperm.xlu2 %2403, %v1742_v39   ;;  %v1945_v39 = vperm.slane %v486_v24, 5 }
 0x113   : > { %1754 = vperm.xlu1 %2402, %v1749_v40   ;;  %v926_v42 = vpop.xlane.xlu0 %925  ;;  %v1896_v40 = vperm.slane %v3111_v14, 6 }
 0x114   : > { %1803 = vperm.xlu0 %2404, %v1798_v41   ;;  %v1092_v43 = vperm.slane %v926_v42, %v2858_v34  ;;  %v3174_v42 = vpop.f32.mrf.mxu2 }
 0x115   : > { %v932_v44 = vpop.xlane.xlu2 %931  ;;  %v929_v45 = vpop.xlane.xlu1 %928  ;;  %v1973_v14 = vperm.slane %v3174_v42, 1 }
 0x116   : > { %v1094_v46 = vperm.slane %v932_v44, %v2858_v34  ;;  %v1093_v47 = vperm.slane %v929_v45, %v2858_v34  ;;  %1611 = vst.msk [vmem:[%s2870_s7 + $0x168] sm:$0xff] %vm1565_vm1, %v1092_v43  ;;  %v1917_v43 = vperm.slane %v486_v24, 1  ;;  %v1966_v44 = vperm.slane %v3174_v42, 0 }
 0x118   : > { %1613 = vst.msk [vmem:[%s2870_s7 + $0x178] sm:$0xff] %vm1565_vm1, %v1094_v46 }
 0x119   : > { %1612 = vst.msk [vmem:[%s2870_s7 + $0x170] sm:$0xff] %vm1565_vm1, %v1093_v47 }
 0x11a   : > { %1768 = vperm.xlu2 %2403, %v1763_v1   ;;  %v1931_v1 = vperm.slane %v486_v24, 3 }
 0x11b   : > { %1775 = vperm.xlu1 %2402, %v1770_v49   ;;  %v935_v51 = vpop.xlane.xlu0 %934  ;;  %v1938_v49 = vperm.slane %v486_v24, 4 }
 0x11c   : > { %1824 = vperm.xlu0 %2404, %v1819_v48   ;;  %v1095_v52 = vperm.slane %v935_v51, %v2858_v34  ;;  %v1987_v48 = vperm.slane %v3174_v42, 3 }
 0x11d   : > { %v941_v53 = vpop.xlane.xlu2 %940  ;;  %v938_v54 = vpop.xlane.xlu1 %937 }
 0x11e   : > { %v1097_v55 = vperm.slane %v941_v53, %v2858_v34  ;;  %v1096_v56 = vperm.slane %v938_v54, %v2858_v34  ;;  %1614 = vst.msk [vmem:[%s2870_s7 + $0x180] sm:$0xff] %vm1565_vm1, %v1095_v52  ;;  %v1952_v54 = vperm.slane %v486_v24, 6 }
 0x120   : > { %1616 = vst.msk [vmem:[%s2870_s7 + $0x190] sm:$0xff] %vm1565_vm1, %v1097_v55  ;;  %v2008_v55 = vperm.slane %v3174_v42, 6 }
 0x121   : > { %1615 = vst.msk [vmem:[%s2870_s7 + $0x188] sm:$0xff] %vm1565_vm1, %v1096_v56  ;;  %v1959_v56 = vperm.slane %v486_v24, 7 }
 0x122   : > { %1789 = vperm.xlu2 %2403, %v1784_v57   ;;  %v538_v57 = vpop.f32.mrf.mxu3 }
 0x123   : > { %1796 = vperm.xlu1 %2402, %v1791_v59   ;;  %v944_v60 = vpop.xlane.xlu0 %943 }
 0x124   : > { %1845 = vperm.xlu0 %2404, %v1840_v58   ;;  %v1098_v25 = vperm.slane %v944_v60, %v2858_v34 }
 0x125   : > { %v950_v61 = vpop.xlane.xlu2 %949  ;;  %v947_v62 = vpop.xlane.xlu1 %946 }
 0x126   : > { %v1100_v63 = vperm.slane %v950_v61, %v2858_v34  ;;  %v1099_v21 = vperm.slane %v947_v62, %v2858_v34  ;;  %1617 = vst.msk [vmem:[%s2870_s7 + $0x198] sm:$0xff] %vm1565_vm1, %v1098_v25  ;;  %v2029_v25 = vperm.slane %v538_v57, 1  ;;  %v1980_v61 = vperm.slane %v3174_v42, 2 }
 0x128   : > { %1619 = vst.msk [vmem:[%s2870_s7 + $0x1a8] sm:$0xff] %vm1565_vm1, %v1100_v63 }
 0x129   : > { %1618 = vst.msk [vmem:[%s2870_s7 + $0x1a0] sm:$0xff] %vm1565_vm1, %v1099_v21 }
 0x12a   : > { %1810 = vperm.xlu2 %2403, %v1805_v7   ;;  %v1994_v7 = vperm.slane %v3174_v42, 4 }
 0x12b   : > { %1817 = vperm.xlu1 %2402, %v1812_v3   ;;  %v953_v4 = vpop.xlane.xlu0 %952  ;;  %v2001_v3 = vperm.slane %v3174_v42, 5 }
 0x12c   : > { %1866 = vperm.xlu0 %2404, %v1861_v2   ;;  %v1101_v5 = vperm.slane %v953_v4, %v2858_v34  ;;  %v2050_v2 = vperm.slane %v538_v57, 4 }
 0x12d   : > { %v959_v8 = vpop.xlane.xlu2 %958  ;;  %v956_v0 = vpop.xlane.xlu1 %955 }
 0x12e   : > { %v1103_v9 = vperm.slane %v959_v8, %v2858_v34  ;;  %v1102_v10 = vperm.slane %v956_v0, %v2858_v34  ;;  %1620 = vst.msk [vmem:[%s2870_s7 + $0x1b0] sm:$0xff] %vm1565_vm1, %v1101_v5  ;;  %v2022_v0 = vperm.slane %v538_v57, 0 }
 0x130   : > { %1622 = vst.msk [vmem:[%s2870_s7 + $0x1c0] sm:$0xff] %vm1565_vm1, %v1103_v9  ;;  %v2015_v9 = vperm.slane %v3174_v42, 7 }
 0x131   : > { %1621 = vst.msk [vmem:[%s2870_s7 + $0x1b8] sm:$0xff] %vm1565_vm1, %v1102_v10  ;;  %v2071_v10 = vperm.slane %v538_v57, 7 }
 0x132   : > { %1831 = vperm.xlu2 %2403, %v1826_v11  }
 0x133   : > { %1838 = vperm.xlu1 %2402, %v1833_v12   ;;  %v962_v13 = vpop.xlane.xlu0 %961 }
 0x134   : > { %1887 = vperm.xlu0 %2404, %v1882_v50   ;;  %v1104_v16 = vperm.slane %v962_v13, %v2858_v34  ;;  %v2036_v13 = vperm.slane %v538_v57, 2 }
 0x135   : > { %v968_v6 = vpop.xlane.xlu2 %967  ;;  %v965_v17 = vpop.xlane.xlu1 %964 }
 0x136   : > { %v1106_v18 = vperm.slane %v968_v6, %v2858_v34  ;;  %v1105_v19 = vperm.slane %v965_v17, %v2858_v34  ;;  %1623 = vst.msk [vmem:[%s2870_s7 + $0x1c8] sm:$0xff] %vm1565_vm1, %v1104_v16  ;;  %v2043_v16 = vperm.slane %v538_v57, 3 }
 0x138   : > { %1625 = vst.msk [vmem:[%s2870_s7 + $0x1d8] sm:$0xff] %vm1565_vm1, %v1106_v18 }
 0x139   : > { %1624 = vst.msk [vmem:[%s2870_s7 + $0x1d0] sm:$0xff] %vm1565_vm1, %v1105_v19  ;;  %v2057_v19 = vperm.slane %v538_v57, 5 }
 0x13a   : > { %1852 = vperm.xlu2 %2403, %v1847_v32  }
 0x13b   : > { %1859 = vperm.xlu1 %2402, %v1854_v20   ;;  %v971_v23 = vpop.xlane.xlu0 %970  ;;  %v2064_v20 = vperm.slane %v538_v57, 6 }
 0x13c   : > { %1908 = vperm.xlu0 %2404, %v1903_v22   ;;  %v1107_v15 = vperm.slane %v971_v23, %v2858_v34 }
 0x13d   : > { %v977_v26 = vpop.xlane.xlu2 %976  ;;  %v974_v27 = vpop.xlane.xlu1 %973 }
 0x13e   : > { %v1109_v28 = vperm.slane %v977_v26, %v2858_v34  ;;  %v1108_v30 = vperm.slane %v974_v27, %v2858_v34  ;;  %1626 = vst.msk [vmem:[%s2870_s7 + $0x1e0] sm:$0xff] %vm1565_vm1, %v1107_v15 }
 0x140   : > { %1628 = vst.msk [vmem:[%s2870_s7 + $0x1f0] sm:$0xff] %vm1565_vm1, %v1109_v28 }
 0x141   : > { %1627 = vst.msk [vmem:[%s2870_s7 + $0x1e8] sm:$0xff] %vm1565_vm1, %v1108_v30 }
 0x142   : > { %1873 = vperm.xlu2 %2403, %v1868_v37  }
 0x143   : > { %1880 = vperm.xlu1 %2402, %v1875_v29   ;;  %v980_v35 = vpop.xlane.xlu0 %979 }
 0x144   : > { %1929 = vperm.xlu0 %2404, %v1924_v33   ;;  %v1110_v36 = vperm.slane %v980_v35, %v2858_v34  ;;  %v1910_v34 = vperm.slane %v486_v24, 0 }
 0x145   : > { %v1643_v31 = vpop.permute.xlu2 %1642 }
 0x146   : > { %2079 = vst.msk [vmem:[%s3165_s14 + $0x8] sm:$0xff] %vm1565_vm1, %v1643_v31 }
 0x147   : > { %1629 = vst.msk [vmem:[%s2870_s7 + $0x1f8] sm:$0xff] %vm1565_vm1, %v1110_v36 }
 0x14a   : > { %1894 = vperm.xlu2 %2403, %v1889_v38  }
 0x14b   : > { %1901 = vperm.xlu1 %2402, %v1896_v40  }
 0x14c   : > { %1950 = vperm.xlu0 %2404, %v1945_v39  }
 0x14d   : > { %v1657_v41 = vpop.permute.xlu2 %1656 }
 0x14e   : > { %2081 = vst.msk [vmem:[%s3165_s14 + $0x18] sm:$0xff] %vm1565_vm1, %v1657_v41 }
 0x152   : > { %1915 = vperm.xlu2 %2403, %v1910_v34  }
 0x153   : > { %1922 = vperm.xlu1 %2402, %v1917_v43  }
 0x154   : > { %1971 = vperm.xlu0 %2404, %v1966_v44  }
 0x155   : > { %v1671_v45 = vpop.permute.xlu2 %1670  ;;  %v1636_v46 = vpop.permute.xlu1 %1635 }
 0x156   : > { %2083 = vst.msk [vmem:[%s3165_s14 + $0x28] sm:$0xff] %vm1565_vm1, %v1671_v45  ;;  %v1650_v47 = vpop.permute.xlu0 %1649 }
 0x157   : > { %2078 = vst.msk [vmem:[%s3165_s14] sm:$0xff] %vm1565_vm1, %v1636_v46 }
 0x158   : > { %2080 = vst.msk [vmem:[%s3165_s14 + $0x10] sm:$0xff] %vm1565_vm1, %v1650_v47 }
 0x15a   : > { %1936 = vperm.xlu2 %2403, %v1931_v1  }
 0x15b   : > { %1943 = vperm.xlu1 %2402, %v1938_v49  }
 0x15c   : > { %1992 = vperm.xlu0 %2404, %v1987_v48  }
 0x15d   : > { %v1685_v51 = vpop.permute.xlu2 %1684  ;;  %v1664_v52 = vpop.permute.xlu1 %1663 }
 0x15e   : > { %2085 = vst.msk [vmem:[%s3165_s14 + $0x38] sm:$0xff] %vm1565_vm1, %v1685_v51  ;;  %v1699_v53 = vpop.permute.xlu0 %1698 }
 0x15f   : > { %2082 = vst.msk [vmem:[%s3165_s14 + $0x20] sm:$0xff] %vm1565_vm1, %v1664_v52 }
 0x160   : > { %2087 = vst.msk [vmem:[%s3165_s14 + $0x48] sm:$0xff] %vm1565_vm1, %v1699_v53 }
 0x162   : > { %1957 = vperm.xlu2 %2403, %v1952_v54  }
 0x163   : > { %1964 = vperm.xlu1 %2402, %v1959_v56  }
 0x164   : > { %2013 = vperm.xlu0 %2404, %v2008_v55  }
 0x165   : > { %v1706_v58 = vpop.permute.xlu2 %1705  ;;  %v1678_v59 = vpop.permute.xlu1 %1677 }
 0x166   : > { %2088 = vst.msk [vmem:[%s3165_s14 + $0x50] sm:$0xff] %vm1565_vm1, %v1706_v58  ;;  %v1720_v60 = vpop.permute.xlu0 %1719 }
 0x167   : > { %2084 = vst.msk [vmem:[%s3165_s14 + $0x30] sm:$0xff] %vm1565_vm1, %v1678_v59 }
 0x168   : > { %2090 = vst.msk [vmem:[%s3165_s14 + $0x60] sm:$0xff] %vm1565_vm1, %v1720_v60 }
 0x16a   : > { %1978 = vperm.xlu2 %2403, %v1973_v14  }
 0x16b   : > { %1985 = vperm.xlu1 %2402, %v1980_v61  }
 0x16c   : > { %2034 = vperm.xlu0 %2404, %v2029_v25  }
 0x16d   : > { %v1727_v62 = vpop.permute.xlu2 %1726  ;;  %v1692_v63 = vpop.permute.xlu1 %1691 }
 0x16e   : > { %2091 = vst.msk [vmem:[%s3165_s14 + $0x68] sm:$0xff] %vm1565_vm1, %v1727_v62  ;;  %v1741_v21 = vpop.permute.xlu0 %1740 }
 0x16f   : > { %2086 = vst.msk [vmem:[%s3165_s14 + $0x40] sm:$0xff] %vm1565_vm1, %v1692_v63 }
 0x170   : > { %2093 = vst.msk [vmem:[%s3165_s14 + $0x78] sm:$0xff] %vm1565_vm1, %v1741_v21 }
 0x172   : > { %1999 = vperm.xlu2 %2403, %v1994_v7  }
 0x173   : > { %2006 = vperm.xlu1 %2402, %v2001_v3  }
 0x174   : > { %2055 = vperm.xlu0 %2404, %v2050_v2  }
 0x175   : > { %v1748_v4 = vpop.permute.xlu2 %1747  ;;  %v1713_v5 = vpop.permute.xlu1 %1712 }
 0x176   : > { %2094 = vst.msk [vmem:[%s3165_s14 + $0x80] sm:$0xff] %vm1565_vm1, %v1748_v4  ;;  %v1762_v8 = vpop.permute.xlu0 %1761 }
 0x177   : > { %2089 = vst.msk [vmem:[%s3165_s14 + $0x58] sm:$0xff] %vm1565_vm1, %v1713_v5 }
 0x178   : > { %2096 = vst.msk [vmem:[%s3165_s14 + $0x90] sm:$0xff] %vm1565_vm1, %v1762_v8 }
 0x17a   : > { %2020 = vperm.xlu2 %2403, %v2015_v9  }
 0x17b   : > { %2027 = vperm.xlu1 %2402, %v2022_v0  }
 0x17c   : > { %2076 = vperm.xlu0 %2404, %v2071_v10  }
 0x17d   : > { %v1769_v11 = vpop.permute.xlu2 %1768  ;;  %v1734_v50 = vpop.permute.xlu1 %1733 }
 0x17e   : > { %2097 = vst.msk [vmem:[%s3165_s14 + $0x98] sm:$0xff] %vm1565_vm1, %v1769_v11  ;;  %v1783_v12 = vpop.permute.xlu0 %1782 }
 0x17f   : > { %2092 = vst.msk [vmem:[%s3165_s14 + $0x70] sm:$0xff] %vm1565_vm1, %v1734_v50 }
 0x180   : > { %2099 = vst.msk [vmem:[%s3165_s14 + $0xa8] sm:$0xff] %vm1565_vm1, %v1783_v12 }
 0x182   : > { %2041 = vperm.xlu2 %2403, %v2036_v13  }
 0x183   : > { %2048 = vperm.xlu1 %2402, %v2043_v16  }
 0x185   : > { %v1790_v6 = vpop.permute.xlu2 %1789  ;;  %v1755_v17 = vpop.permute.xlu1 %1754 }
 0x186   : > { %2100 = vst.msk [vmem:[%s3165_s14 + $0xb0] sm:$0xff] %vm1565_vm1, %v1790_v6  ;;  %v1804_v18 = vpop.permute.xlu0 %1803 }
 0x187   : > { %2095 = vst.msk [vmem:[%s3165_s14 + $0x88] sm:$0xff] %vm1565_vm1, %v1755_v17 }
 0x188   : > { %2102 = vst.msk [vmem:[%s3165_s14 + $0xc0] sm:$0xff] %vm1565_vm1, %v1804_v18 }
 0x18a   : > { %2062 = vperm.xlu2 %2403, %v2057_v19  }
 0x18b   : > { %2069 = vperm.xlu1 %2402, %v2064_v20  }
 0x18d   : > { %v1811_v32 = vpop.permute.xlu2 %1810  ;;  %v1776_v22 = vpop.permute.xlu1 %1775 }
 0x18e   : > { %2103 = vst.msk [vmem:[%s3165_s14 + $0xc8] sm:$0xff] %vm1565_vm1, %v1811_v32  ;;  %v1825_v23 = vpop.permute.xlu0 %1824 }
 0x18f   : > { %2098 = vst.msk [vmem:[%s3165_s14 + $0xa0] sm:$0xff] %vm1565_vm1, %v1776_v22 }
 0x190   : > { %2105 = vst.msk [vmem:[%s3165_s14 + $0xd8] sm:$0xff] %vm1565_vm1, %v1825_v23 }
 0x195   : > { %v1832_v24 = vpop.permute.xlu2 %1831  ;;  %v1797_v15 = vpop.permute.xlu1 %1796 }
 0x196   : > { %2106 = vst.msk [vmem:[%s3165_s14 + $0xe0] sm:$0xff] %vm1565_vm1, %v1832_v24  ;;  %v1846_v26 = vpop.permute.xlu0 %1845 }
 0x197   : > { %2101 = vst.msk [vmem:[%s3165_s14 + $0xb8] sm:$0xff] %vm1565_vm1, %v1797_v15 }
 0x198   : > { %2108 = vst.msk [vmem:[%s3165_s14 + $0xf0] sm:$0xff] %vm1565_vm1, %v1846_v26 }
 0x19d   : > { %v1853_v27 = vpop.permute.xlu2 %1852  ;;  %v1818_v28 = vpop.permute.xlu1 %1817 }
 0x19e   : > { %2109 = vst.msk [vmem:[%s3165_s14 + $0xf8] sm:$0xff] %vm1565_vm1, %v1853_v27  ;;  %v1867_v30 = vpop.permute.xlu0 %1866 }
 0x19f   : > { %2104 = vst.msk [vmem:[%s3165_s14 + $0xd0] sm:$0xff] %vm1565_vm1, %v1818_v28 }
 0x1a0   : > { %2111 = vst.msk [vmem:[%s3165_s14 + $0x108] sm:$0xff] %vm1565_vm1, %v1867_v30 }
 0x1a5   : > { %v1839_v37 = vpop.permute.xlu1 %1838  ;;  %v1874_v33 = vpop.permute.xlu2 %1873 }
 0x1a6   : > { %2107 = vst.msk [vmem:[%s3165_s14 + $0xe8] sm:$0xff] %vm1565_vm1, %v1839_v37  ;;  %v1888_v29 = vpop.permute.xlu0 %1887 }
 0x1a7   : > { %2112 = vst.msk [vmem:[%s3165_s14 + $0x110] sm:$0xff] %vm1565_vm1, %v1874_v33 }
 0x1a8   : > { %2114 = vst.msk [vmem:[%s3165_s14 + $0x120] sm:$0xff] %vm1565_vm1, %v1888_v29 }
 0x1ad   : > { %v1895_v35 = vpop.permute.xlu2 %1894  ;;  %v1860_v36 = vpop.permute.xlu1 %1859 }
 0x1ae   : > { %2115 = vst.msk [vmem:[%s3165_s14 + $0x128] sm:$0xff] %vm1565_vm1, %v1895_v35  ;;  %v1909_v31 = vpop.permute.xlu0 %1908 }
 0x1af   : > { %2110 = vst.msk [vmem:[%s3165_s14 + $0x100] sm:$0xff] %vm1565_vm1, %v1860_v36 }
 0x1b0   : > { %2117 = vst.msk [vmem:[%s3165_s14 + $0x138] sm:$0xff] %vm1565_vm1, %v1909_v31 }
 0x1b5   : > { %v1916_v38 = vpop.permute.xlu2 %1915  ;;  %v1881_v39 = vpop.permute.xlu1 %1880 }
 0x1b6   : > { %2118 = vst.msk [vmem:[%s3165_s14 + $0x140] sm:$0xff] %vm1565_vm1, %v1916_v38  ;;  %v1930_v40 = vpop.permute.xlu0 %1929 }
 0x1b7   : > { %2113 = vst.msk [vmem:[%s3165_s14 + $0x118] sm:$0xff] %vm1565_vm1, %v1881_v39 }
 0x1b8   : > { %2120 = vst.msk [vmem:[%s3165_s14 + $0x150] sm:$0xff] %vm1565_vm1, %v1930_v40 }
 0x1bd   : > { %v1937_v41 = vpop.permute.xlu2 %1936  ;;  %v1902_v42 = vpop.permute.xlu1 %1901 }
 0x1be   : > { %2121 = vst.msk [vmem:[%s3165_s14 + $0x158] sm:$0xff] %vm1565_vm1, %v1937_v41  ;;  %v1951_v34 = vpop.permute.xlu0 %1950 }
 0x1bf   : > { %2116 = vst.msk [vmem:[%s3165_s14 + $0x130] sm:$0xff] %vm1565_vm1, %v1902_v42 }
 0x1c0   : > { %2123 = vst.msk [vmem:[%s3165_s14 + $0x168] sm:$0xff] %vm1565_vm1, %v1951_v34 }
 0x1c5   : > { %v1958_v43 = vpop.permute.xlu2 %1957  ;;  %v1923_v44 = vpop.permute.xlu1 %1922 }
 0x1c6   : > { %2124 = vst.msk [vmem:[%s3165_s14 + $0x170] sm:$0xff] %vm1565_vm1, %v1958_v43  ;;  %v1972_v45 = vpop.permute.xlu0 %1971 }
 0x1c7   : > { %2119 = vst.msk [vmem:[%s3165_s14 + $0x148] sm:$0xff] %vm1565_vm1, %v1923_v44 }
 0x1c8   : > { %2126 = vst.msk [vmem:[%s3165_s14 + $0x180] sm:$0xff] %vm1565_vm1, %v1972_v45 }
 0x1cd   : > { %v1979_v46 = vpop.permute.xlu2 %1978  ;;  %v1944_v47 = vpop.permute.xlu1 %1943 }
 0x1ce   : > { %2127 = vst.msk [vmem:[%s3165_s14 + $0x188] sm:$0xff] %vm1565_vm1, %v1979_v46  ;;  %v1993_v1 = vpop.permute.xlu0 %1992 }
 0x1cf   : > { %2122 = vst.msk [vmem:[%s3165_s14 + $0x160] sm:$0xff] %vm1565_vm1, %v1944_v47 }
 0x1d0   : > { %2129 = vst.msk [vmem:[%s3165_s14 + $0x198] sm:$0xff] %vm1565_vm1, %v1993_v1 }
 0x1d5   : > { %v2000_v48 = vpop.permute.xlu2 %1999  ;;  %v1965_v49 = vpop.permute.xlu1 %1964 }
 0x1d6   : > { %2130 = vst.msk [vmem:[%s3165_s14 + $0x1a0] sm:$0xff] %vm1565_vm1, %v2000_v48  ;;  %v2014_v51 = vpop.permute.xlu0 %2013 }
 0x1d7   : > { %2125 = vst.msk [vmem:[%s3165_s14 + $0x178] sm:$0xff] %vm1565_vm1, %v1965_v49 }
 0x1d8   : > { %2132 = vst.msk [vmem:[%s3165_s14 + $0x1b0] sm:$0xff] %vm1565_vm1, %v2014_v51 }
 0x1dd   : > { %v2021_v52 = vpop.permute.xlu2 %2020  ;;  %v1986_v53 = vpop.permute.xlu1 %1985 }
 0x1de   : > { %2133 = vst.msk [vmem:[%s3165_s14 + $0x1b8] sm:$0xff] %vm1565_vm1, %v2021_v52  ;;  %v2035_v54 = vpop.permute.xlu0 %2034 }
 0x1df   : > { %2128 = vst.msk [vmem:[%s3165_s14 + $0x190] sm:$0xff] %vm1565_vm1, %v1986_v53 }
 0x1e0   : > { %2135 = vst.msk [vmem:[%s3165_s14 + $0x1c8] sm:$0xff] %vm1565_vm1, %v2035_v54 }
 0x1e5   : > { %v2042_v55 = vpop.permute.xlu2 %2041  ;;  %v2007_v56 = vpop.permute.xlu1 %2006 }
 0x1e6   : > { %2136 = vst.msk [vmem:[%s3165_s14 + $0x1d0] sm:$0xff] %vm1565_vm1, %v2042_v55  ;;  %v2056_v57 = vpop.permute.xlu0 %2055 }
 0x1e7   : > { %2131 = vst.msk [vmem:[%s3165_s14 + $0x1a8] sm:$0xff] %vm1565_vm1, %v2007_v56 }
 0x1e8   : > { %2138 = vst.msk [vmem:[%s3165_s14 + $0x1e0] sm:$0xff] %vm1565_vm1, %v2056_v57 }
 0x1ed   : > { %v2063_v58 = vpop.permute.xlu2 %2062  ;;  %v2028_v59 = vpop.permute.xlu1 %2027 }
 0x1ee   : > { %2139 = vst.msk [vmem:[%s3165_s14 + $0x1e8] sm:$0xff] %vm1565_vm1, %v2063_v58  ;;  %v2077_v60 = vpop.permute.xlu0 %2076 }
 0x1ef   : > { %2134 = vst.msk [vmem:[%s3165_s14 + $0x1c0] sm:$0xff] %vm1565_vm1, %v2028_v59 }
 0x1f0   : > { %2141 = vst.msk [vmem:[%s3165_s14 + $0x1f8] sm:$0xff] %vm1565_vm1, %v2077_v60 }
 0x1f5   : > { %v2049_v14 = vpop.permute.xlu1 %2048 }
 0x1f6   : > { %2137 = vst.msk [vmem:[%s3165_s14 + $0x1d8] sm:$0xff] %vm1565_vm1, %v2049_v14 }
 0x1fd   : > { %v2070_v25 = vpop.permute.xlu1 %2069 }
 0x1fe   : > { %2140 = vst.msk [vmem:[%s3165_s14 + $0x1f0] sm:$0xff] %vm1565_vm1, %v2070_v25 }
 0x1ff PF: > { %s19_s20 = sadd.s32 1, %s2549_s20   ;;  %s3337_s15 = smov %s2533_s16 }
 0x200   : > { %p16_p2 = scmp.ge.s32.totalorder %s19_s20, 6   ;;  %s3338_s16 = smov %s2537_s17 }
 0x201   : > { %s3339_s17 = smov %s2659_s25  ;;  %s3340_s18 = smov %s2545_s19 }
 0x202   : > { %s3341_s19 = smov %s3343_s11  ;;  %18 = sbr.rel (!%p16_p2) target bundleno = 5 (0x5), region = 93 }
 0x207   :  { %2191 = vsyncpa [#allocation3], 1 }
 0x208   :  { %2193 = vsyncpa [#allocation3 + $0x1], 1 }
 0x209   :  { %2194 = vsyncpa [#allocation5], 1 }

</bundles_post_ra>
